<compile_context>
chip_gen: v7x
topology: tpu7x:2x2x1
jax: 0.10.0
libtpu: 0.0.40
codegen_flags: <defaults>
</compile_context>

<pallas_src>
import jax
import jax.numpy as jnp
from jax.experimental import pallas as pl
from jax.experimental.pallas import tpu as pltpu


def _bilstm_kernel(gxf_ref, gxb_ref, whh_hbm,                    # inputs
                   out_f_ref, out_b_ref, hN_ref, cN_ref,          # outputs
                   whh_v, sem, hf_s, cf_s, hb_s, cb_s):           # scratch
    ci = pl.program_id(0)
    nC = pl.num_programs(0)
    Tc = gxf_ref.shape[0]
    H = hf_s.shape[-1]

    @pl.when(ci == 0)
    def _init():
        # Single-buffered resident recurrent weights: one DMA HBM -> VMEM.
        cp = pltpu.make_async_copy(whh_hbm, whh_v, sem.at[0])
        cp.start()
        cp.wait()
        hf_s[...] = jnp.zeros_like(hf_s)
        cf_s[...] = jnp.zeros_like(cf_s)
        hb_s[...] = jnp.zeros_like(hb_s)
        cb_s[...] = jnp.zeros_like(cb_s)

    whh_f = whh_v[0]   # (H, 4H)
    whh_b = whh_v[1]   # (H, 4H)

    def cell(gates, c):
        # gates: (B, 4H), PyTorch order [i, f, g, o]; all math in f32.
        i = jax.nn.sigmoid(gates[:, 0 * H:1 * H])
        f = jax.nn.sigmoid(gates[:, 1 * H:2 * H])
        g = jnp.tanh(gates[:, 2 * H:3 * H])
        o = jax.nn.sigmoid(gates[:, 3 * H:4 * H])
        c_new = f * c + i * g
        h_new = o * jnp.tanh(c_new)
        return h_new, c_new

    def step(j, carry):
        hf, cf, hb, cb = carry
        # Forward direction: local chunk time j (original time ci*Tc + j).
        gates_f = gxf_ref[j] + jnp.dot(hf, whh_f,
                                       preferred_element_type=jnp.float32)
        hf, cf = cell(gates_f, cf)
        out_f_ref[j] = hf
        # Backward direction: this grid step's gx/out blocks are the reversed
        # chunk (index_map nC-1-ci); local reversed index gives original
        # time T-1-(ci*Tc + j).
        jr = Tc - 1 - j
        gates_b = gxb_ref[jr] + jnp.dot(hb, whh_b,
                                        preferred_element_type=jnp.float32)
        hb, cb = cell(gates_b, cb)
        out_b_ref[jr] = hb
        return (hf, cf, hb, cb)

    carry0 = (hf_s[...], cf_s[...], hb_s[...], cb_s[...])
    hf, cf, hb, cb = jax.lax.fori_loop(0, Tc, step, carry0, unroll=True)
    hf_s[...] = hf
    cf_s[...] = cf
    hb_s[...] = hb
    cb_s[...] = cb

    @pl.when(ci == nC - 1)
    def _finalize():
        hN_ref[0] = hf
        hN_ref[1] = hb
        cN_ref[0] = cf
        cN_ref[1] = cb


def bilstm_encoder(x_btI, params, *, time_chunk=None,
                   vmem_budget_bytes=20 * 1024 * 1024):
    """x_btI: (B, T, I) f32.

    Returns (lstm_out (B,T,2H), (hidden (2,B,H), cell (2,B,H))).
    """
    B, T, I = x_btI.shape
    H = params["whh_f"].shape[0]

    # Pad batch to a multiple of 8 sublanes (padded rows are sliced off below).
    Bp = max(8, ((B + 7) // 8) * 8)

    # --- pick time chunk: must divide T (no time padding: it would corrupt the
    # backward recurrence init); largest <= 16 whose double-buffered chunk
    # buffers fit the VMEM budget.
    def _chunk_bytes(tc):
        gx_in = 2 * 2 * tc * Bp * 4 * H * 4   # two dirs, double-buffered inputs
        outs = 2 * 2 * tc * Bp * H * 4        # two dirs, double-buffered outputs
        return gx_in + outs

    cands = [c for c in range(1, min(T, 16) + 1)
             if T % c == 0 and _chunk_bytes(c) <= vmem_budget_bytes]
    Tc = max(cands) if cands else 1
    if time_chunk is not None and 0 < time_chunk <= T and T % time_chunk == 0:
        Tc = time_chunk
    nC = T // Tc

    x_tbi = jnp.transpose(x_btI, (1, 0, 2))  # (T, B, I)
    if Bp != B:
        x_tbi = jnp.pad(x_tbi, ((0, 0), (0, Bp - B), (0, 0)))

    # Recurrent weights stacked into one HBM array (single DMA in the kernel).
    whh_stack = jnp.stack([params["whh_f"], params["whh_b"]], axis=0)  # (2,H,4H)

    lane_split_ok = (4 * H) % 128 == 0
    if lane_split_ok:
        # One hoisted projection (T*Bp, I) @ (I, 8H); the kernel reads the two
        # 4H halves of the SAME HBM buffer through two BlockSpecs.
        wih_cat = jnp.concatenate([params["wih_f"], params["wih_b"]], axis=1)
        b_cat = jnp.concatenate([params["b_f"], params["b_b"]], axis=1)
        gx = (x_tbi.reshape(T * Bp, I) @ wih_cat + b_cat).reshape(T, Bp, 8 * H)
        gx_args = (gx, gx)
        gx_specs = [
            pl.BlockSpec((Tc, Bp, 4 * H), lambda c: (c, 0, 0)),           # fwd half
            pl.BlockSpec((Tc, Bp, 4 * H), lambda c: (nC - 1 - c, 0, 1)),  # bwd half
        ]
    else:
        # 4H not lane-aligned: per-direction projections (block last dim = full).
        gx_f = (x_tbi.reshape(T * Bp, I) @ params["wih_f"]
                + params["b_f"]).reshape(T, Bp, 4 * H)
        gx_b = (x_tbi.reshape(T * Bp, I) @ params["wih_b"]
                + params["b_b"]).reshape(T, Bp, 4 * H)
        gx_args = (gx_f, gx_b)
        gx_specs = [
            pl.BlockSpec((Tc, Bp, 4 * H), lambda c: (c, 0, 0)),
            pl.BlockSpec((Tc, Bp, 4 * H), lambda c: (nC - 1 - c, 0, 0)),
        ]

    grid_spec = pltpu.PrefetchScalarGridSpec(
        num_scalar_prefetch=0,
        grid=(nC,),
        in_specs=gx_specs + [
            pl.BlockSpec(memory_space=pl.ANY),                            # W_hh (HBM)
        ],
        out_specs=[
            pl.BlockSpec((Tc, Bp, H), lambda c: (c, 0, 0)),               # out fwd
            pl.BlockSpec((Tc, Bp, H), lambda c: (nC - 1 - c, 0, 0)),      # out bwd
            pl.BlockSpec((2, Bp, H), lambda c: (0, 0, 0)),                # final h
            pl.BlockSpec((2, Bp, H), lambda c: (0, 0, 0)),                # final c
        ],
        scratch_shapes=[
            pltpu.VMEM((2, H, 4 * H), jnp.float32),   # W_hh, single-buffered
            pltpu.SemaphoreType.DMA((1,)),
            pltpu.VMEM((Bp, H), jnp.float32),         # h fwd
            pltpu.VMEM((Bp, H), jnp.float32),         # c fwd
            pltpu.VMEM((Bp, H), jnp.float32),         # h bwd
            pltpu.VMEM((Bp, H), jnp.float32),         # c bwd
        ],
    )

    out_f, out_b, hN, cN = pl.pallas_call(
        _bilstm_kernel,
        out_shape=(
            jax.ShapeDtypeStruct((T, Bp, H), jnp.float32),
            jax.ShapeDtypeStruct((T, Bp, H), jnp.float32),
            jax.ShapeDtypeStruct((2, Bp, H), jnp.float32),
            jax.ShapeDtypeStruct((2, Bp, H), jnp.float32),
        ),
        grid_spec=grid_spec,
        compiler_params=pltpu.CompilerParams(
            # Recurrence across chunks => strictly sequential time axis.
            dimension_semantics=("arbitrary",),
            vmem_limit_bytes=32 * 1024 * 1024,
        ),
    )(*gx_args, whh_stack)

    out_f = out_f[:, :B]
    out_b = out_b[:, :B]
    lstm_out = jnp.transpose(jnp.concatenate([out_f, out_b], axis=-1), (1, 0, 2))
    hidden = hN[:, :B]
    cell = cN[:, :B]
    return lstm_out, (hidden, cell)


def init_params(key, input_size, hidden_size):
    """Deterministic init mimicking PyTorch nn.LSTM: U(-1/sqrt(H), 1/sqrt(H))."""
    k = 1.0 / jnp.sqrt(hidden_size)
    keys = jax.random.split(key, 8)

    def u(kk, shape):
        return jax.random.uniform(kk, shape, jnp.float32, -k, k)

    # PyTorch stores weight_ih as (4H, I); kernel uses transposed (I, 4H).
    w_ih_f = u(keys[0], (4 * hidden_size, input_size))
    w_hh_f = u(keys[1], (4 * hidden_size, hidden_size))
    b_ih_f = u(keys[2], (4 * hidden_size,))
    b_hh_f = u(keys[3], (4 * hidden_size,))
    w_ih_b = u(keys[4], (4 * hidden_size, input_size))
    w_hh_b = u(keys[5], (4 * hidden_size, hidden_size))
    b_ih_b = u(keys[6], (4 * hidden_size,))
    b_hh_b = u(keys[7], (4 * hidden_size,))

    return {
        "wih_f": w_ih_f.T, "whh_f": w_hh_f.T, "b_f": (b_ih_f + b_hh_f)[None, :],
        "wih_b": w_ih_b.T, "whh_b": w_hh_b.T, "b_b": (b_ih_b + b_hh_b)[None, :],
    }


def _reference_bilstm(x_btI, params):
    """Pure-JAX reference (lax.scan) for correctness checking."""
    H = params["whh_f"].shape[0]

    def run_dir(x_tbi, wih, whh, b):
        B = x_tbi.shape[1]

        def step(carry, x_t):
            h, c = carry
            gates = x_t @ wih + h @ whh + b
            i = jax.nn.sigmoid(gates[:, 0 * H:1 * H])
            f = jax.nn.sigmoid(gates[:, 1 * H:2 * H])
            g = jnp.tanh(gates[:, 2 * H:3 * H])
            o = jax.nn.sigmoid(gates[:, 3 * H:4 * H])
            c_new = f * c + i * g
            h_new = o * jnp.tanh(c_new)
            return (h_new, c_new), h_new

        init = (jnp.zeros((B, H), jnp.float32), jnp.zeros((B, H), jnp.float32))
        (hN, cN), hs = jax.lax.scan(step, init, x_tbi)
        return hs, hN, cN

    x_tbi = jnp.transpose(x_btI, (1, 0, 2))
    hs_f, hN_f, cN_f = run_dir(x_tbi, params["wih_f"], params["whh_f"], params["b_f"])
    hs_b, hN_b, cN_b = run_dir(x_tbi[::-1], params["wih_b"], params["whh_b"], params["b_b"])
    hs_b = hs_b[::-1]
    out = jnp.transpose(jnp.concatenate([hs_f, hs_b], axis=-1), (1, 0, 2))
    hidden = jnp.stack([hN_f, hN_b], axis=0)
    cell = jnp.stack([cN_f, cN_b], axis=0)
    return out, (hidden, cell)


if __name__ == "__main__":
    B, T, I, H = 2, 16, 4, 32   # 16 timesteps -> 4 chunks of 4 exercises state carry
    key = jax.random.PRNGKey(0)
    kx, kp = jax.random.split(key)
    x = jax.random.normal(kx, (B, T, I), jnp.float32)
    params = init_params(kp, I, H)

    lstm_out, (hidden, cell) = bilstm_encoder(x, params, time_chunk=4)
    jax.block_until_ready((lstm_out, hidden, cell))

    ref_out, (ref_h, ref_c) = _reference_bilstm(x, params)
    assert lstm_out.shape == (B, T, 2 * H)
    assert hidden.shape == (2, B, H) and cell.shape == (2, B, H)
    assert jnp.allclose(lstm_out, ref_out, atol=1e-4, rtol=1e-4)
    assert jnp.allclose(hidden, ref_h, atol=1e-4, rtol=1e-4)
    assert jnp.allclose(cell, ref_c, atol=1e-4, rtol=1e-4)

    print("KERNEL_OK")
</pallas_src>

<mosaic_0001>
module attributes {stable_mosaic.version = 11 : i64} {
  func.func @_bilstm_kernel(%arg0: i32, %arg1: memref<4x8x128xf32, #tpu.memory_space<vmem>>, %arg2: memref<4x8x128xf32, #tpu.memory_space<vmem>>, %arg3: memref<2x32x128xf32, #tpu.memory_space<any>>, %arg4: memref<4x8x32xf32, #tpu.memory_space<vmem>>, %arg5: memref<4x8x32xf32, #tpu.memory_space<vmem>>, %arg6: memref<2x8x32xf32, #tpu.memory_space<vmem>>, %arg7: memref<2x8x32xf32, #tpu.memory_space<vmem>>, %arg8: memref<2x32x128xf32, #tpu.memory_space<vmem>>, %arg9: memref<1x!tpu.dma_semaphore, #tpu.memory_space<semaphore_mem>>, %arg10: memref<8x32xf32, #tpu.memory_space<vmem>>, %arg11: memref<8x32xf32, #tpu.memory_space<vmem>>, %arg12: memref<8x32xf32, #tpu.memory_space<vmem>>, %arg13: memref<8x32xf32, #tpu.memory_space<vmem>>) attributes {dimension_semantics = [#tpu.dimension_semantics<arbitrary>], iteration_bounds = array<i64: 4>, scalar_prefetch = 0 : i64, scratch_operands = 6 : i64, tpu.core_type = #tpu.core_type<tc>, window_params = [{transform_indices = @transform_0, window_bounds = array<i64: 4, 8, 128>}, {transform_indices = @transform_1, window_bounds = array<i64: 4, 8, 128>}, {}, {transform_indices = @transform_3, window_bounds = array<i64: 4, 8, 32>}, {transform_indices = @transform_4, window_bounds = array<i64: 4, 8, 32>}, {pipeline_mode = #tpu.pipeline_mode<synchronous>, transform_indices = @transform_5, window_bounds = array<i64: 2, 8, 32>}, {pipeline_mode = #tpu.pipeline_mode<synchronous>, transform_indices = @transform_6, window_bounds = array<i64: 2, 8, 32>}]} {
    %c0_i32 = arith.constant 0 : i32
    %0 = arith.cmpi eq, %arg0, %c0_i32 : i32
    %1 = arith.extui %0 : i1 to i32
    %c0_i32_0 = arith.constant 0 : i32
    %2 = arith.cmpi ne, %1, %c0_i32_0 : i32
    scf.if %2 {
      %c0_i32_91 = arith.constant 0 : i32
      %294 = tpu.memref_slice %arg9[%c0_i32_91] : memref<1x!tpu.dma_semaphore, #tpu.memory_space<semaphore_mem>> -> memref<1x!tpu.dma_semaphore, #tpu.memory_space<semaphore_mem>>
      %295 = tpu.memref_squeeze %294 : memref<1x!tpu.dma_semaphore, #tpu.memory_space<semaphore_mem>> -> memref<!tpu.dma_semaphore, #tpu.memory_space<semaphore_mem>>
      tpu.enqueue_dma source(%arg3 : memref<2x32x128xf32, #tpu.memory_space<any>>) target(%arg8 : memref<2x32x128xf32, #tpu.memory_space<vmem>>) target_semaphore(%295 : memref<!tpu.dma_semaphore, #tpu.memory_space<semaphore_mem>>)
      %c0_i32_92 = arith.constant 0 : i32
      %296 = tpu.memref_slice %arg9[%c0_i32_92] : memref<1x!tpu.dma_semaphore, #tpu.memory_space<semaphore_mem>> -> memref<1x!tpu.dma_semaphore, #tpu.memory_space<semaphore_mem>>
      %297 = tpu.memref_squeeze %296 : memref<1x!tpu.dma_semaphore, #tpu.memory_space<semaphore_mem>> -> memref<!tpu.dma_semaphore, #tpu.memory_space<semaphore_mem>>
      tpu.wait_dma2 semaphore(%297 : memref<!tpu.dma_semaphore, #tpu.memory_space<semaphore_mem>>) src(%arg3 : memref<2x32x128xf32, #tpu.memory_space<any>>) dst(%arg8 : memref<2x32x128xf32, #tpu.memory_space<vmem>>)
      %cst_93 = arith.constant 0.000000e+00 : f32
      %298 = vector.broadcast %cst_93 : f32 to vector<8x32xf32>
      %c0_94 = arith.constant 0 : index
      %c0_95 = arith.constant 0 : index
      %299 = vector.load %arg10[%c0_94, %c0_95] : memref<8x32xf32, #tpu.memory_space<vmem>>, vector<8x32xf32>
      tpu.vector_store %arg10[%c0_94, %c0_95], %298 {strides = array<i32>} : memref<8x32xf32, #tpu.memory_space<vmem>>, vector<8x32xf32>,
      %cst_96 = arith.constant 0.000000e+00 : f32
      %300 = vector.broadcast %cst_96 : f32 to vector<8x32xf32>
      %c0_97 = arith.constant 0 : index
      %c0_98 = arith.constant 0 : index
      %301 = vector.load %arg11[%c0_97, %c0_98] : memref<8x32xf32, #tpu.memory_space<vmem>>, vector<8x32xf32>
      tpu.vector_store %arg11[%c0_97, %c0_98], %300 {strides = array<i32>} : memref<8x32xf32, #tpu.memory_space<vmem>>, vector<8x32xf32>,
      %cst_99 = arith.constant 0.000000e+00 : f32
      %302 = vector.broadcast %cst_99 : f32 to vector<8x32xf32>
      %c0_100 = arith.constant 0 : index
      %c0_101 = arith.constant 0 : index
      %303 = vector.load %arg12[%c0_100, %c0_101] : memref<8x32xf32, #tpu.memory_space<vmem>>, vector<8x32xf32>
      tpu.vector_store %arg12[%c0_100, %c0_101], %302 {strides = array<i32>} : memref<8x32xf32, #tpu.memory_space<vmem>>, vector<8x32xf32>,
      %cst_102 = arith.constant 0.000000e+00 : f32
      %304 = vector.broadcast %cst_102 : f32 to vector<8x32xf32>
      %c0_103 = arith.constant 0 : index
      %c0_104 = arith.constant 0 : index
      %305 = vector.load %arg13[%c0_103, %c0_104] : memref<8x32xf32, #tpu.memory_space<vmem>>, vector<8x32xf32>
      tpu.vector_store %arg13[%c0_103, %c0_104], %304 {strides = array<i32>} : memref<8x32xf32, #tpu.memory_space<vmem>>, vector<8x32xf32>,
    } else {
    }
    %c0 = arith.constant 0 : index
    %c0_1 = arith.constant 0 : index
    %c0_2 = arith.constant 0 : index
    %3 = vector.load %arg8[%c0, %c0_1, %c0_2] : memref<2x32x128xf32, #tpu.memory_space<vmem>>, vector<1x32x128xf32>
    %4 = vector.shape_cast %3 : vector<1x32x128xf32> to vector<32x128xf32>
    %c1 = arith.constant 1 : index
    %c0_3 = arith.constant 0 : index
    %c0_4 = arith.constant 0 : index
    %5 = vector.load %arg8[%c1, %c0_3, %c0_4] : memref<2x32x128xf32, #tpu.memory_space<vmem>>, vector<1x32x128xf32>
    %6 = vector.shape_cast %5 : vector<1x32x128xf32> to vector<32x128xf32>
    %c0_5 = arith.constant 0 : index
    %c0_6 = arith.constant 0 : index
    %7 = vector.load %arg10[%c0_5, %c0_6] : memref<8x32xf32, #tpu.memory_space<vmem>>, vector<8x32xf32>
    %c0_7 = arith.constant 0 : index
    %c0_8 = arith.constant 0 : index
    %8 = vector.load %arg11[%c0_7, %c0_8] : memref<8x32xf32, #tpu.memory_space<vmem>>, vector<8x32xf32>
    %c0_9 = arith.constant 0 : index
    %c0_10 = arith.constant 0 : index
    %9 = vector.load %arg12[%c0_9, %c0_10] : memref<8x32xf32, #tpu.memory_space<vmem>>, vector<8x32xf32>
    %c0_11 = arith.constant 0 : index
    %c0_12 = arith.constant 0 : index
    %10 = vector.load %arg13[%c0_11, %c0_12] : memref<8x32xf32, #tpu.memory_space<vmem>>, vector<8x32xf32>
    %c0_i32_13 = arith.constant 0 : i32
    %11 = arith.index_cast %c0_i32_13 : i32 to index
    %c0_14 = arith.constant 0 : index
    %c0_15 = arith.constant 0 : index
    %12 = vector.load %arg1[%11, %c0_14, %c0_15] : memref<4x8x128xf32, #tpu.memory_space<vmem>>, vector<1x8x128xf32>
    %13 = vector.shape_cast %12 : vector<1x8x128xf32> to vector<8x128xf32>
    %cst = arith.constant dense<0.000000e+00> : vector<8x128xf32>
    %14 = tpu.matmul %7, %4, %cst {dimension_numbers = #tpu.dot_dimension_numbers<[1], [0], [0], [1], [0, 0, 1, 1], [], []>} : vector<8x32xf32>, vector<32x128xf32>, vector<8x128xf32> -> vector<8x128xf32>
    %15 = arith.addf %13, %14 : vector<8x128xf32>
    %16 = vector.extract_strided_slice %15 {offsets = [0, 0], sizes = [8, 32], strides = [1, 1]} : vector<8x128xf32> to vector<8x32xf32>
    %17 = arith.negf %16 : vector<8x32xf32>
    %18 = math.exp %17 : vector<8x32xf32>
    %cst_16 = arith.constant 1.000000e+00 : f32
    %19 = vector.broadcast %cst_16 : f32 to vector<8x32xf32>
    %20 = arith.addf %19, %18 : vector<8x32xf32>
    %21 = arith.divf %19, %20 : vector<8x32xf32>
    %22 = vector.extract_strided_slice %15 {offsets = [0, 32], sizes = [8, 32], strides = [1, 1]} : vector<8x128xf32> to vector<8x32xf32>
    %23 = arith.negf %22 : vector<8x32xf32>
    %24 = math.exp %23 : vector<8x32xf32>
    %cst_17 = arith.constant 1.000000e+00 : f32
    %25 = vector.broadcast %cst_17 : f32 to vector<8x32xf32>
    %26 = arith.addf %25, %24 : vector<8x32xf32>
    %27 = arith.divf %25, %26 : vector<8x32xf32>
    %28 = vector.extract_strided_slice %15 {offsets = [0, 64], sizes = [8, 32], strides = [1, 1]} : vector<8x128xf32> to vector<8x32xf32>
    %29 = math.tanh %28 : vector<8x32xf32>
    %30 = vector.extract_strided_slice %15 {offsets = [0, 96], sizes = [8, 32], strides = [1, 1]} : vector<8x128xf32> to vector<8x32xf32>
    %31 = arith.negf %30 : vector<8x32xf32>
    %32 = math.exp %31 : vector<8x32xf32>
    %cst_18 = arith.constant 1.000000e+00 : f32
    %33 = vector.broadcast %cst_18 : f32 to vector<8x32xf32>
    %34 = arith.addf %33, %32 : vector<8x32xf32>
    %35 = arith.divf %33, %34 : vector<8x32xf32>
    %36 = arith.mulf %27, %8 : vector<8x32xf32>
    %37 = arith.mulf %21, %29 : vector<8x32xf32>
    %38 = arith.addf %36, %37 : vector<8x32xf32>
    %39 = math.tanh %38 : vector<8x32xf32>
    %40 = arith.mulf %35, %39 : vector<8x32xf32>
    %41 = arith.index_cast %c0_i32_13 : i32 to index
    %c0_19 = arith.constant 0 : index
    %c0_20 = arith.constant 0 : index
    %42 = vector.load %arg4[%41, %c0_19, %c0_20] : memref<4x8x32xf32, #tpu.memory_space<vmem>>, vector<1x8x32xf32>
    %43 = vector.shape_cast %42 : vector<1x8x32xf32> to vector<8x32xf32>
    %44 = vector.shape_cast %40 : vector<8x32xf32> to vector<1x8x32xf32>
    tpu.vector_store %arg4[%41, %c0_19, %c0_20], %44 {strides = array<i32>} : memref<4x8x32xf32, #tpu.memory_space<vmem>>, vector<1x8x32xf32>,
    %c3_i32 = arith.constant 3 : i32
    %45 = arith.subi %c3_i32, %c0_i32_13 : i32
    %46 = arith.index_cast %45 : i32 to index
    %c0_21 = arith.constant 0 : index
    %c0_22 = arith.constant 0 : index
    %47 = vector.load %arg2[%46, %c0_21, %c0_22] : memref<4x8x128xf32, #tpu.memory_space<vmem>>, vector<1x8x128xf32>
    %48 = vector.shape_cast %47 : vector<1x8x128xf32> to vector<8x128xf32>
    %cst_23 = arith.constant dense<0.000000e+00> : vector<8x128xf32>
    %49 = tpu.matmul %9, %6, %cst_23 {dimension_numbers = #tpu.dot_dimension_numbers<[1], [0], [0], [1], [0, 0, 1, 1], [], []>} : vector<8x32xf32>, vector<32x128xf32>, vector<8x128xf32> -> vector<8x128xf32>
    %50 = arith.addf %48, %49 : vector<8x128xf32>
    %51 = vector.extract_strided_slice %50 {offsets = [0, 0], sizes = [8, 32], strides = [1, 1]} : vector<8x128xf32> to vector<8x32xf32>
    %52 = arith.negf %51 : vector<8x32xf32>
    %53 = math.exp %52 : vector<8x32xf32>
    %cst_24 = arith.constant 1.000000e+00 : f32
    %54 = vector.broadcast %cst_24 : f32 to vector<8x32xf32>
    %55 = arith.addf %54, %53 : vector<8x32xf32>
    %56 = arith.divf %54, %55 : vector<8x32xf32>
    %57 = vector.extract_strided_slice %50 {offsets = [0, 32], sizes = [8, 32], strides = [1, 1]} : vector<8x128xf32> to vector<8x32xf32>
    %58 = arith.negf %57 : vector<8x32xf32>
    %59 = math.exp %58 : vector<8x32xf32>
    %cst_25 = arith.constant 1.000000e+00 : f32
    %60 = vector.broadcast %cst_25 : f32 to vector<8x32xf32>
    %61 = arith.addf %60, %59 : vector<8x32xf32>
    %62 = arith.divf %60, %61 : vector<8x32xf32>
    %63 = vector.extract_strided_slice %50 {offsets = [0, 64], sizes = [8, 32], strides = [1, 1]} : vector<8x128xf32> to vector<8x32xf32>
    %64 = math.tanh %63 : vector<8x32xf32>
    %65 = vector.extract_strided_slice %50 {offsets = [0, 96], sizes = [8, 32], strides = [1, 1]} : vector<8x128xf32> to vector<8x32xf32>
    %66 = arith.negf %65 : vector<8x32xf32>
    %67 = math.exp %66 : vector<8x32xf32>
    %cst_26 = arith.constant 1.000000e+00 : f32
    %68 = vector.broadcast %cst_26 : f32 to vector<8x32xf32>
    %69 = arith.addf %68, %67 : vector<8x32xf32>
    %70 = arith.divf %68, %69 : vector<8x32xf32>
    %71 = arith.mulf %62, %10 : vector<8x32xf32>
    %72 = arith.mulf %56, %64 : vector<8x32xf32>
    %73 = arith.addf %71, %72 : vector<8x32xf32>
    %74 = math.tanh %73 : vector<8x32xf32>
    %75 = arith.mulf %70, %74 : vector<8x32xf32>
    %76 = arith.index_cast %45 : i32 to index
    %c0_27 = arith.constant 0 : index
    %c0_28 = arith.constant 0 : index
    %77 = vector.load %arg5[%76, %c0_27, %c0_28] : memref<4x8x32xf32, #tpu.memory_space<vmem>>, vector<1x8x32xf32>
    %78 = vector.shape_cast %77 : vector<1x8x32xf32> to vector<8x32xf32>
    %79 = vector.shape_cast %75 : vector<8x32xf32> to vector<1x8x32xf32>
    tpu.vector_store %arg5[%76, %c0_27, %c0_28], %79 {strides = array<i32>} : memref<4x8x32xf32, #tpu.memory_space<vmem>>, vector<1x8x32xf32>,
    %c1_i32 = arith.constant 1 : i32
    %80 = arith.index_cast %c1_i32 : i32 to index
    %c0_29 = arith.constant 0 : index
    %c0_30 = arith.constant 0 : index
    %81 = vector.load %arg1[%80, %c0_29, %c0_30] : memref<4x8x128xf32, #tpu.memory_space<vmem>>, vector<1x8x128xf32>
    %82 = vector.shape_cast %81 : vector<1x8x128xf32> to vector<8x128xf32>
    %cst_31 = arith.constant dense<0.000000e+00> : vector<8x128xf32>
    %83 = tpu.matmul %40, %4, %cst_31 {dimension_numbers = #tpu.dot_dimension_numbers<[1], [0], [0], [1], [0, 0, 1, 1], [], []>} : vector<8x32xf32>, vector<32x128xf32>, vector<8x128xf32> -> vector<8x128xf32>
    %84 = arith.addf %82, %83 : vector<8x128xf32>
    %85 = vector.extract_strided_slice %84 {offsets = [0, 0], sizes = [8, 32], strides = [1, 1]} : vector<8x128xf32> to vector<8x32xf32>
    %86 = arith.negf %85 : vector<8x32xf32>
    %87 = math.exp %86 : vector<8x32xf32>
    %cst_32 = arith.constant 1.000000e+00 : f32
    %88 = vector.broadcast %cst_32 : f32 to vector<8x32xf32>
    %89 = arith.addf %88, %87 : vector<8x32xf32>
    %90 = arith.divf %88, %89 : vector<8x32xf32>
    %91 = vector.extract_strided_slice %84 {offsets = [0, 32], sizes = [8, 32], strides = [1, 1]} : vector<8x128xf32> to vector<8x32xf32>
    %92 = arith.negf %91 : vector<8x32xf32>
    %93 = math.exp %92 : vector<8x32xf32>
    %cst_33 = arith.constant 1.000000e+00 : f32
    %94 = vector.broadcast %cst_33 : f32 to vector<8x32xf32>
    %95 = arith.addf %94, %93 : vector<8x32xf32>
    %96 = arith.divf %94, %95 : vector<8x32xf32>
    %97 = vector.extract_strided_slice %84 {offsets = [0, 64], sizes = [8, 32], strides = [1, 1]} : vector<8x128xf32> to vector<8x32xf32>
    %98 = math.tanh %97 : vector<8x32xf32>
    %99 = vector.extract_strided_slice %84 {offsets = [0, 96], sizes = [8, 32], strides = [1, 1]} : vector<8x128xf32> to vector<8x32xf32>
    %100 = arith.negf %99 : vector<8x32xf32>
    %101 = math.exp %100 : vector<8x32xf32>
    %cst_34 = arith.constant 1.000000e+00 : f32
    %102 = vector.broadcast %cst_34 : f32 to vector<8x32xf32>
    %103 = arith.addf %102, %101 : vector<8x32xf32>
    %104 = arith.divf %102, %103 : vector<8x32xf32>
    %105 = arith.mulf %96, %38 : vector<8x32xf32>
    %106 = arith.mulf %90, %98 : vector<8x32xf32>
    %107 = arith.addf %105, %106 : vector<8x32xf32>
    %108 = math.tanh %107 : vector<8x32xf32>
    %109 = arith.mulf %104, %108 : vector<8x32xf32>
    %110 = arith.index_cast %c1_i32 : i32 to index
    %c0_35 = arith.constant 0 : index
    %c0_36 = arith.constant 0 : index
    %111 = vector.load %arg4[%110, %c0_35, %c0_36] : memref<4x8x32xf32, #tpu.memory_space<vmem>>, vector<1x8x32xf32>
    %112 = vector.shape_cast %111 : vector<1x8x32xf32> to vector<8x32xf32>
    %113 = vector.shape_cast %109 : vector<8x32xf32> to vector<1x8x32xf32>
    tpu.vector_store %arg4[%110, %c0_35, %c0_36], %113 {strides = array<i32>} : memref<4x8x32xf32, #tpu.memory_space<vmem>>, vector<1x8x32xf32>,
    %c3_i32_37 = arith.constant 3 : i32
    %114 = arith.subi %c3_i32_37, %c1_i32 : i32
    %115 = arith.index_cast %114 : i32 to index
    %c0_38 = arith.constant 0 : index
    %c0_39 = arith.constant 0 : index
    %116 = vector.load %arg2[%115, %c0_38, %c0_39] : memref<4x8x128xf32, #tpu.memory_space<vmem>>, vector<1x8x128xf32>
    %117 = vector.shape_cast %116 : vector<1x8x128xf32> to vector<8x128xf32>
    %cst_40 = arith.constant dense<0.000000e+00> : vector<8x128xf32>
    %118 = tpu.matmul %75, %6, %cst_40 {dimension_numbers = #tpu.dot_dimension_numbers<[1], [0], [0], [1], [0, 0, 1, 1], [], []>} : vector<8x32xf32>, vector<32x128xf32>, vector<8x128xf32> -> vector<8x128xf32>
    %119 = arith.addf %117, %118 : vector<8x128xf32>
    %120 = vector.extract_strided_slice %119 {offsets = [0, 0], sizes = [8, 32], strides = [1, 1]} : vector<8x128xf32> to vector<8x32xf32>
    %121 = arith.negf %120 : vector<8x32xf32>
    %122 = math.exp %121 : vector<8x32xf32>
    %cst_41 = arith.constant 1.000000e+00 : f32
    %123 = vector.broadcast %cst_41 : f32 to vector<8x32xf32>
    %124 = arith.addf %123, %122 : vector<8x32xf32>
    %125 = arith.divf %123, %124 : vector<8x32xf32>
    %126 = vector.extract_strided_slice %119 {offsets = [0, 32], sizes = [8, 32], strides = [1, 1]} : vector<8x128xf32> to vector<8x32xf32>
    %127 = arith.negf %126 : vector<8x32xf32>
    %128 = math.exp %127 : vector<8x32xf32>
    %cst_42 = arith.constant 1.000000e+00 : f32
    %129 = vector.broadcast %cst_42 : f32 to vector<8x32xf32>
    %130 = arith.addf %129, %128 : vector<8x32xf32>
    %131 = arith.divf %129, %130 : vector<8x32xf32>
    %132 = vector.extract_strided_slice %119 {offsets = [0, 64], sizes = [8, 32], strides = [1, 1]} : vector<8x128xf32> to vector<8x32xf32>
    %133 = math.tanh %132 : vector<8x32xf32>
    %134 = vector.extract_strided_slice %119 {offsets = [0, 96], sizes = [8, 32], strides = [1, 1]} : vector<8x128xf32> to vector<8x32xf32>
    %135 = arith.negf %134 : vector<8x32xf32>
    %136 = math.exp %135 : vector<8x32xf32>
    %cst_43 = arith.constant 1.000000e+00 : f32
    %137 = vector.broadcast %cst_43 : f32 to vector<8x32xf32>
    %138 = arith.addf %137, %136 : vector<8x32xf32>
    %139 = arith.divf %137, %138 : vector<8x32xf32>
    %140 = arith.mulf %131, %73 : vector<8x32xf32>
    %141 = arith.mulf %125, %133 : vector<8x32xf32>
    %142 = arith.addf %140, %141 : vector<8x32xf32>
    %143 = math.tanh %142 : vector<8x32xf32>
    %144 = arith.mulf %139, %143 : vector<8x32xf32>
    %145 = arith.index_cast %114 : i32 to index
    %c0_44 = arith.constant 0 : index
    %c0_45 = arith.constant 0 : index
    %146 = vector.load %arg5[%145, %c0_44, %c0_45] : memref<4x8x32xf32, #tpu.memory_space<vmem>>, vector<1x8x32xf32>
    %147 = vector.shape_cast %146 : vector<1x8x32xf32> to vector<8x32xf32>
    %148 = vector.shape_cast %144 : vector<8x32xf32> to vector<1x8x32xf32>
    tpu.vector_store %arg5[%145, %c0_44, %c0_45], %148 {strides = array<i32>} : memref<4x8x32xf32, #tpu.memory_space<vmem>>, vector<1x8x32xf32>,
    %c2_i32 = arith.constant 2 : i32
    %149 = arith.index_cast %c2_i32 : i32 to index
    %c0_46 = arith.constant 0 : index
    %c0_47 = arith.constant 0 : index
    %150 = vector.load %arg1[%149, %c0_46, %c0_47] : memref<4x8x128xf32, #tpu.memory_space<vmem>>, vector<1x8x128xf32>
    %151 = vector.shape_cast %150 : vector<1x8x128xf32> to vector<8x128xf32>
    %cst_48 = arith.constant dense<0.000000e+00> : vector<8x128xf32>
    %152 = tpu.matmul %109, %4, %cst_48 {dimension_numbers = #tpu.dot_dimension_numbers<[1], [0], [0], [1], [0, 0, 1, 1], [], []>} : vector<8x32xf32>, vector<32x128xf32>, vector<8x128xf32> -> vector<8x128xf32>
    %153 = arith.addf %151, %152 : vector<8x128xf32>
    %154 = vector.extract_strided_slice %153 {offsets = [0, 0], sizes = [8, 32], strides = [1, 1]} : vector<8x128xf32> to vector<8x32xf32>
    %155 = arith.negf %154 : vector<8x32xf32>
    %156 = math.exp %155 : vector<8x32xf32>
    %cst_49 = arith.constant 1.000000e+00 : f32
    %157 = vector.broadcast %cst_49 : f32 to vector<8x32xf32>
    %158 = arith.addf %157, %156 : vector<8x32xf32>
    %159 = arith.divf %157, %158 : vector<8x32xf32>
    %160 = vector.extract_strided_slice %153 {offsets = [0, 32], sizes = [8, 32], strides = [1, 1]} : vector<8x128xf32> to vector<8x32xf32>
    %161 = arith.negf %160 : vector<8x32xf32>
    %162 = math.exp %161 : vector<8x32xf32>
    %cst_50 = arith.constant 1.000000e+00 : f32
    %163 = vector.broadcast %cst_50 : f32 to vector<8x32xf32>
    %164 = arith.addf %163, %162 : vector<8x32xf32>
    %165 = arith.divf %163, %164 : vector<8x32xf32>
    %166 = vector.extract_strided_slice %153 {offsets = [0, 64], sizes = [8, 32], strides = [1, 1]} : vector<8x128xf32> to vector<8x32xf32>
    %167 = math.tanh %166 : vector<8x32xf32>
    %168 = vector.extract_strided_slice %153 {offsets = [0, 96], sizes = [8, 32], strides = [1, 1]} : vector<8x128xf32> to vector<8x32xf32>
    %169 = arith.negf %168 : vector<8x32xf32>
    %170 = math.exp %169 : vector<8x32xf32>
    %cst_51 = arith.constant 1.000000e+00 : f32
    %171 = vector.broadcast %cst_51 : f32 to vector<8x32xf32>
    %172 = arith.addf %171, %170 : vector<8x32xf32>
    %173 = arith.divf %171, %172 : vector<8x32xf32>
    %174 = arith.mulf %165, %107 : vector<8x32xf32>
    %175 = arith.mulf %159, %167 : vector<8x32xf32>
    %176 = arith.addf %174, %175 : vector<8x32xf32>
    %177 = math.tanh %176 : vector<8x32xf32>
    %178 = arith.mulf %173, %177 : vector<8x32xf32>
    %179 = arith.index_cast %c2_i32 : i32 to index
    %c0_52 = arith.constant 0 : index
    %c0_53 = arith.constant 0 : index
    %180 = vector.load %arg4[%179, %c0_52, %c0_53] : memref<4x8x32xf32, #tpu.memory_space<vmem>>, vector<1x8x32xf32>
    %181 = vector.shape_cast %180 : vector<1x8x32xf32> to vector<8x32xf32>
    %182 = vector.shape_cast %178 : vector<8x32xf32> to vector<1x8x32xf32>
    tpu.vector_store %arg4[%179, %c0_52, %c0_53], %182 {strides = array<i32>} : memref<4x8x32xf32, #tpu.memory_space<vmem>>, vector<1x8x32xf32>,
    %c3_i32_54 = arith.constant 3 : i32
    %183 = arith.subi %c3_i32_54, %c2_i32 : i32
    %184 = arith.index_cast %183 : i32 to index
    %c0_55 = arith.constant 0 : index
    %c0_56 = arith.constant 0 : index
    %185 = vector.load %arg2[%184, %c0_55, %c0_56] : memref<4x8x128xf32, #tpu.memory_space<vmem>>, vector<1x8x128xf32>
    %186 = vector.shape_cast %185 : vector<1x8x128xf32> to vector<8x128xf32>
    %cst_57 = arith.constant dense<0.000000e+00> : vector<8x128xf32>
    %187 = tpu.matmul %144, %6, %cst_57 {dimension_numbers = #tpu.dot_dimension_numbers<[1], [0], [0], [1], [0, 0, 1, 1], [], []>} : vector<8x32xf32>, vector<32x128xf32>, vector<8x128xf32> -> vector<8x128xf32>
    %188 = arith.addf %186, %187 : vector<8x128xf32>
    %189 = vector.extract_strided_slice %188 {offsets = [0, 0], sizes = [8, 32], strides = [1, 1]} : vector<8x128xf32> to vector<8x32xf32>
    %190 = arith.negf %189 : vector<8x32xf32>
    %191 = math.exp %190 : vector<8x32xf32>
    %cst_58 = arith.constant 1.000000e+00 : f32
    %192 = vector.broadcast %cst_58 : f32 to vector<8x32xf32>
    %193 = arith.addf %192, %191 : vector<8x32xf32>
    %194 = arith.divf %192, %193 : vector<8x32xf32>
    %195 = vector.extract_strided_slice %188 {offsets = [0, 32], sizes = [8, 32], strides = [1, 1]} : vector<8x128xf32> to vector<8x32xf32>
    %196 = arith.negf %195 : vector<8x32xf32>
    %197 = math.exp %196 : vector<8x32xf32>
    %cst_59 = arith.constant 1.000000e+00 : f32
    %198 = vector.broadcast %cst_59 : f32 to vector<8x32xf32>
    %199 = arith.addf %198, %197 : vector<8x32xf32>
    %200 = arith.divf %198, %199 : vector<8x32xf32>
    %201 = vector.extract_strided_slice %188 {offsets = [0, 64], sizes = [8, 32], strides = [1, 1]} : vector<8x128xf32> to vector<8x32xf32>
    %202 = math.tanh %201 : vector<8x32xf32>
    %203 = vector.extract_strided_slice %188 {offsets = [0, 96], sizes = [8, 32], strides = [1, 1]} : vector<8x128xf32> to vector<8x32xf32>
    %204 = arith.negf %203 : vector<8x32xf32>
    %205 = math.exp %204 : vector<8x32xf32>
    %cst_60 = arith.constant 1.000000e+00 : f32
    %206 = vector.broadcast %cst_60 : f32 to vector<8x32xf32>
    %207 = arith.addf %206, %205 : vector<8x32xf32>
    %208 = arith.divf %206, %207 : vector<8x32xf32>
    %209 = arith.mulf %200, %142 : vector<8x32xf32>
    %210 = arith.mulf %194, %202 : vector<8x32xf32>
    %211 = arith.addf %209, %210 : vector<8x32xf32>
    %212 = math.tanh %211 : vector<8x32xf32>
    %213 = arith.mulf %208, %212 : vector<8x32xf32>
    %214 = arith.index_cast %183 : i32 to index
    %c0_61 = arith.constant 0 : index
    %c0_62 = arith.constant 0 : index
    %215 = vector.load %arg5[%214, %c0_61, %c0_62] : memref<4x8x32xf32, #tpu.memory_space<vmem>>, vector<1x8x32xf32>
    %216 = vector.shape_cast %215 : vector<1x8x32xf32> to vector<8x32xf32>
    %217 = vector.shape_cast %213 : vector<8x32xf32> to vector<1x8x32xf32>
    tpu.vector_store %arg5[%214, %c0_61, %c0_62], %217 {strides = array<i32>} : memref<4x8x32xf32, #tpu.memory_space<vmem>>, vector<1x8x32xf32>,
    %c3_i32_63 = arith.constant 3 : i32
    %218 = arith.index_cast %c3_i32_63 : i32 to index
    %c0_64 = arith.constant 0 : index
    %c0_65 = arith.constant 0 : index
    %219 = vector.load %arg1[%218, %c0_64, %c0_65] : memref<4x8x128xf32, #tpu.memory_space<vmem>>, vector<1x8x128xf32>
    %220 = vector.shape_cast %219 : vector<1x8x128xf32> to vector<8x128xf32>
    %cst_66 = arith.constant dense<0.000000e+00> : vector<8x128xf32>
    %221 = tpu.matmul %178, %4, %cst_66 {dimension_numbers = #tpu.dot_dimension_numbers<[1], [0], [0], [1], [0, 0, 1, 1], [], []>} : vector<8x32xf32>, vector<32x128xf32>, vector<8x128xf32> -> vector<8x128xf32>
    %222 = arith.addf %220, %221 : vector<8x128xf32>
    %223 = vector.extract_strided_slice %222 {offsets = [0, 0], sizes = [8, 32], strides = [1, 1]} : vector<8x128xf32> to vector<8x32xf32>
    %224 = arith.negf %223 : vector<8x32xf32>
    %225 = math.exp %224 : vector<8x32xf32>
    %cst_67 = arith.constant 1.000000e+00 : f32
    %226 = vector.broadcast %cst_67 : f32 to vector<8x32xf32>
    %227 = arith.addf %226, %225 : vector<8x32xf32>
    %228 = arith.divf %226, %227 : vector<8x32xf32>
    %229 = vector.extract_strided_slice %222 {offsets = [0, 32], sizes = [8, 32], strides = [1, 1]} : vector<8x128xf32> to vector<8x32xf32>
    %230 = arith.negf %229 : vector<8x32xf32>
    %231 = math.exp %230 : vector<8x32xf32>
    %cst_68 = arith.constant 1.000000e+00 : f32
    %232 = vector.broadcast %cst_68 : f32 to vector<8x32xf32>
    %233 = arith.addf %232, %231 : vector<8x32xf32>
    %234 = arith.divf %232, %233 : vector<8x32xf32>
    %235 = vector.extract_strided_slice %222 {offsets = [0, 64], sizes = [8, 32], strides = [1, 1]} : vector<8x128xf32> to vector<8x32xf32>
    %236 = math.tanh %235 : vector<8x32xf32>
    %237 = vector.extract_strided_slice %222 {offsets = [0, 96], sizes = [8, 32], strides = [1, 1]} : vector<8x128xf32> to vector<8x32xf32>
    %238 = arith.negf %237 : vector<8x32xf32>
    %239 = math.exp %238 : vector<8x32xf32>
    %cst_69 = arith.constant 1.000000e+00 : f32
    %240 = vector.broadcast %cst_69 : f32 to vector<8x32xf32>
    %241 = arith.addf %240, %239 : vector<8x32xf32>
    %242 = arith.divf %240, %241 : vector<8x32xf32>
    %243 = arith.mulf %234, %176 : vector<8x32xf32>
    %244 = arith.mulf %228, %236 : vector<8x32xf32>
    %245 = arith.addf %243, %244 : vector<8x32xf32>
    %246 = math.tanh %245 : vector<8x32xf32>
    %247 = arith.mulf %242, %246 : vector<8x32xf32>
    %248 = arith.index_cast %c3_i32_63 : i32 to index
    %c0_70 = arith.constant 0 : index
    %c0_71 = arith.constant 0 : index
    %249 = vector.load %arg4[%248, %c0_70, %c0_71] : memref<4x8x32xf32, #tpu.memory_space<vmem>>, vector<1x8x32xf32>
    %250 = vector.shape_cast %249 : vector<1x8x32xf32> to vector<8x32xf32>
    %251 = vector.shape_cast %247 : vector<8x32xf32> to vector<1x8x32xf32>
    tpu.vector_store %arg4[%248, %c0_70, %c0_71], %251 {strides = array<i32>} : memref<4x8x32xf32, #tpu.memory_space<vmem>>, vector<1x8x32xf32>,
    %c3_i32_72 = arith.constant 3 : i32
    %252 = arith.subi %c3_i32_72, %c3_i32_63 : i32
    %253 = arith.index_cast %252 : i32 to index
    %c0_73 = arith.constant 0 : index
    %c0_74 = arith.constant 0 : index
    %254 = vector.load %arg2[%253, %c0_73, %c0_74] : memref<4x8x128xf32, #tpu.memory_space<vmem>>, vector<1x8x128xf32>
    %255 = vector.shape_cast %254 : vector<1x8x128xf32> to vector<8x128xf32>
    %cst_75 = arith.constant dense<0.000000e+00> : vector<8x128xf32>
    %256 = tpu.matmul %213, %6, %cst_75 {dimension_numbers = #tpu.dot_dimension_numbers<[1], [0], [0], [1], [0, 0, 1, 1], [], []>} : vector<8x32xf32>, vector<32x128xf32>, vector<8x128xf32> -> vector<8x128xf32>
    %257 = arith.addf %255, %256 : vector<8x128xf32>
    %258 = vector.extract_strided_slice %257 {offsets = [0, 0], sizes = [8, 32], strides = [1, 1]} : vector<8x128xf32> to vector<8x32xf32>
    %259 = arith.negf %258 : vector<8x32xf32>
    %260 = math.exp %259 : vector<8x32xf32>
    %cst_76 = arith.constant 1.000000e+00 : f32
    %261 = vector.broadcast %cst_76 : f32 to vector<8x32xf32>
    %262 = arith.addf %261, %260 : vector<8x32xf32>
    %263 = arith.divf %261, %262 : vector<8x32xf32>
    %264 = vector.extract_strided_slice %257 {offsets = [0, 32], sizes = [8, 32], strides = [1, 1]} : vector<8x128xf32> to vector<8x32xf32>
    %265 = arith.negf %264 : vector<8x32xf32>
    %266 = math.exp %265 : vector<8x32xf32>
    %cst_77 = arith.constant 1.000000e+00 : f32
    %267 = vector.broadcast %cst_77 : f32 to vector<8x32xf32>
    %268 = arith.addf %267, %266 : vector<8x32xf32>
    %269 = arith.divf %267, %268 : vector<8x32xf32>
    %270 = vector.extract_strided_slice %257 {offsets = [0, 64], sizes = [8, 32], strides = [1, 1]} : vector<8x128xf32> to vector<8x32xf32>
    %271 = math.tanh %270 : vector<8x32xf32>
    %272 = vector.extract_strided_slice %257 {offsets = [0, 96], sizes = [8, 32], strides = [1, 1]} : vector<8x128xf32> to vector<8x32xf32>
    %273 = arith.negf %272 : vector<8x32xf32>
    %274 = math.exp %273 : vector<8x32xf32>
    %cst_78 = arith.constant 1.000000e+00 : f32
    %275 = vector.broadcast %cst_78 : f32 to vector<8x32xf32>
    %276 = arith.addf %275, %274 : vector<8x32xf32>
    %277 = arith.divf %275, %276 : vector<8x32xf32>
    %278 = arith.mulf %269, %211 : vector<8x32xf32>
    %279 = arith.mulf %263, %271 : vector<8x32xf32>
    %280 = arith.addf %278, %279 : vector<8x32xf32>
    %281 = math.tanh %280 : vector<8x32xf32>
    %282 = arith.mulf %277, %281 : vector<8x32xf32>
    %283 = arith.index_cast %252 : i32 to index
    %c0_79 = arith.constant 0 : index
    %c0_80 = arith.constant 0 : index
    %284 = vector.load %arg5[%283, %c0_79, %c0_80] : memref<4x8x32xf32, #tpu.memory_space<vmem>>, vector<1x8x32xf32>
    %285 = vector.shape_cast %284 : vector<1x8x32xf32> to vector<8x32xf32>
    %286 = vector.shape_cast %282 : vector<8x32xf32> to vector<1x8x32xf32>
    tpu.vector_store %arg5[%283, %c0_79, %c0_80], %286 {strides = array<i32>} : memref<4x8x32xf32, #tpu.memory_space<vmem>>, vector<1x8x32xf32>,
    %c4_i32 = arith.constant 4 : i32
    %c0_81 = arith.constant 0 : index
    %c0_82 = arith.constant 0 : index
    %287 = vector.load %arg10[%c0_81, %c0_82] : memref<8x32xf32, #tpu.memory_space<vmem>>, vector<8x32xf32>
    tpu.vector_store %arg10[%c0_81, %c0_82], %247 {strides = array<i32>} : memref<8x32xf32, #tpu.memory_space<vmem>>, vector<8x32xf32>,
    %c0_83 = arith.constant 0 : index
    %c0_84 = arith.constant 0 : index
    %288 = vector.load %arg11[%c0_83, %c0_84] : memref<8x32xf32, #tpu.memory_space<vmem>>, vector<8x32xf32>
    tpu.vector_store %arg11[%c0_83, %c0_84], %245 {strides = array<i32>} : memref<8x32xf32, #tpu.memory_space<vmem>>, vector<8x32xf32>,
    %c0_85 = arith.constant 0 : index
    %c0_86 = arith.constant 0 : index
    %289 = vector.load %arg12[%c0_85, %c0_86] : memref<8x32xf32, #tpu.memory_space<vmem>>, vector<8x32xf32>
    tpu.vector_store %arg12[%c0_85, %c0_86], %282 {strides = array<i32>} : memref<8x32xf32, #tpu.memory_space<vmem>>, vector<8x32xf32>,
    %c0_87 = arith.constant 0 : index
    %c0_88 = arith.constant 0 : index
    %290 = vector.load %arg13[%c0_87, %c0_88] : memref<8x32xf32, #tpu.memory_space<vmem>>, vector<8x32xf32>
    tpu.vector_store %arg13[%c0_87, %c0_88], %280 {strides = array<i32>} : memref<8x32xf32, #tpu.memory_space<vmem>>, vector<8x32xf32>,
    %c3_i32_89 = arith.constant 3 : i32
    %291 = arith.cmpi eq, %arg0, %c3_i32_89 : i32
    %292 = arith.extui %291 : i1 to i32
    %c0_i32_90 = arith.constant 0 : i32
    %293 = arith.cmpi ne, %292, %c0_i32_90 : i32
    scf.if %293 {
      %c0_91 = arith.constant 0 : index
      %c0_92 = arith.constant 0 : index
      %c0_93 = arith.constant 0 : index
      %294 = vector.load %arg6[%c0_91, %c0_92, %c0_93] : memref<2x8x32xf32, #tpu.memory_space<vmem>>, vector<1x8x32xf32>
      %295 = vector.shape_cast %294 : vector<1x8x32xf32> to vector<8x32xf32>
      %296 = vector.shape_cast %247 : vector<8x32xf32> to vector<1x8x32xf32>
      tpu.vector_store %arg6[%c0_91, %c0_92, %c0_93], %296 {strides = array<i32>} : memref<2x8x32xf32, #tpu.memory_space<vmem>>, vector<1x8x32xf32>,
      %c1_94 = arith.constant 1 : index
      %c0_95 = arith.constant 0 : index
      %c0_96 = arith.constant 0 : index
      %297 = vector.load %arg6[%c1_94, %c0_95, %c0_96] : memref<2x8x32xf32, #tpu.memory_space<vmem>>, vector<1x8x32xf32>
      %298 = vector.shape_cast %297 : vector<1x8x32xf32> to vector<8x32xf32>
      %299 = vector.shape_cast %282 : vector<8x32xf32> to vector<1x8x32xf32>
      tpu.vector_store %arg6[%c1_94, %c0_95, %c0_96], %299 {strides = array<i32>} : memref<2x8x32xf32, #tpu.memory_space<vmem>>, vector<1x8x32xf32>,
      %c0_97 = arith.constant 0 : index
      %c0_98 = arith.constant 0 : index
      %c0_99 = arith.constant 0 : index
      %300 = vector.load %arg7[%c0_97, %c0_98, %c0_99] : memref<2x8x32xf32, #tpu.memory_space<vmem>>, vector<1x8x32xf32>
      %301 = vector.shape_cast %300 : vector<1x8x32xf32> to vector<8x32xf32>
      %302 = vector.shape_cast %245 : vector<8x32xf32> to vector<1x8x32xf32>
      tpu.vector_store %arg7[%c0_97, %c0_98, %c0_99], %302 {strides = array<i32>} : memref<2x8x32xf32, #tpu.memory_space<vmem>>, vector<1x8x32xf32>,
      %c1_100 = arith.constant 1 : index
      %c0_101 = arith.constant 0 : index
      %c0_102 = arith.constant 0 : index
      %303 = vector.load %arg7[%c1_100, %c0_101, %c0_102] : memref<2x8x32xf32, #tpu.memory_space<vmem>>, vector<1x8x32xf32>
      %304 = vector.shape_cast %303 : vector<1x8x32xf32> to vector<8x32xf32>
      %305 = vector.shape_cast %280 : vector<8x32xf32> to vector<1x8x32xf32>
      tpu.vector_store %arg7[%c1_100, %c0_101, %c0_102], %305 {strides = array<i32>} : memref<2x8x32xf32, #tpu.memory_space<vmem>>, vector<1x8x32xf32>,
    } else {
    }
    return
  }
  func.func @transform_0(%arg0: i32) -> (i32, i32, i32) {
    %c0_i32 = arith.constant 0 : i32
    %c0_i32_0 = arith.constant 0 : i32
    %c0_i32_1 = arith.constant 0 : i32
    return %arg0, %c0_i32, %c0_i32_0 : i32, i32, i32
  }
  func.func @transform_1(%arg0: i32) -> (i32, i32, i32) {
    %c3_i32 = arith.constant 3 : i32
    %0 = arith.subi %c3_i32, %arg0 : i32
    %c0_i32 = arith.constant 0 : i32
    %c1_i32 = arith.constant 1 : i32
    %c0_i32_0 = arith.constant 0 : i32
    return %0, %c0_i32, %c1_i32 : i32, i32, i32
  }
  func.func @transform_3(%arg0: i32) -> (i32, i32, i32) {
    %c0_i32 = arith.constant 0 : i32
    %c0_i32_0 = arith.constant 0 : i32
    %c0_i32_1 = arith.constant 0 : i32
    return %arg0, %c0_i32, %c0_i32_0 : i32, i32, i32
  }
  func.func @transform_4(%arg0: i32) -> (i32, i32, i32) {
    %c3_i32 = arith.constant 3 : i32
    %0 = arith.subi %c3_i32, %arg0 : i32
    %c0_i32 = arith.constant 0 : i32
    %c0_i32_0 = arith.constant 0 : i32
    %c0_i32_1 = arith.constant 0 : i32
    return %0, %c0_i32, %c0_i32_0 : i32, i32, i32
  }
  func.func @transform_5(%arg0: i32) -> (i32, i32, i32) {
    %c0_i32 = arith.constant 0 : i32
    %c0_i32_0 = arith.constant 0 : i32
    %c0_i32_1 = arith.constant 0 : i32
    %c0_i32_2 = arith.constant 0 : i32
    return %c0_i32, %c0_i32_0, %c0_i32_1 : i32, i32, i32
  }
  func.func @transform_6(%arg0: i32) -> (i32, i32, i32) {
    %c0_i32 = arith.constant 0 : i32
    %c0_i32_0 = arith.constant 0 : i32
    %c0_i32_1 = arith.constant 0 : i32
    %c0_i32_2 = arith.constant 0 : i32
    return %c0_i32, %c0_i32_0, %c0_i32_1 : i32, i32, i32
  }
}

</mosaic_0001>

<bundles_post_ra>
// kernel: tpu_custom_call.1
= control target key start
LH: loop header
LB: loop body
LE: loop exit
PB: predicated region body
PF: predicated region fallthrough
CT: control target
= control target key end

     0   :  { %s2718_s0 = inlined_call_operand.hbm [shape: f32[16,8,256], index: 0, kind: input, shape index: {}]   ;;  %s2719_s1 = inlined_call_operand.hbm [shape: f32[16,8,256], index: 1, kind: input, shape index: {}]   ;;  %s2720_s2 = inlined_call_operand.hbm [shape: f32[2,32,128], index: 2, kind: input, shape index: {}]   ;;  %s2721_s3 = inlined_call_operand.hbm [shape: f32[16,8,32], index: 3, kind: output, shape index: {0}]   ;;  %s2722_s4 = inlined_call_operand.hbm [shape: f32[16,8,32], index: 4, kind: output, shape index: {1}]   ;;  %s2723_s5 = inlined_call_operand.hbm [shape: f32[2,8,32], index: 5, kind: output, shape index: {2}]   ;;  %s2724_s6 = inlined_call_operand.hbm [shape: f32[2,8,32], index: 6, kind: output, shape index: {3}]  }
   0x1   :  { %2739 = sst [smem:[#allocation34_spill]] %s2718_s0 }
   0x2   :  { %2740 = sst [smem:[#allocation35_spill]] %s2719_s1 }
   0x3   :  { %12 = vsyncpa [#allocation9], 0 }
   0x4   :  { %14 = vsyncpa [#allocation9 + $0x1], 0 }
   0x5   :  { %15 = vsyncpa [#allocation12], 0 }
   0x6   :  { %17 = vsyncpa [#allocation12 + $0x1], 0 }
   0x7   :  { %18 = vsyncpa [#allocation10], 0 }
   0x8   :  { %20 = vsyncpa [#allocation10 + $0x1], 0 }
   0x9   :  { %21 = vsyncpa [#allocation15], 0 }
   0xa   :  { %23 = vsyncpa [#allocation15 + $0x1], 0 }
   0xb   :  { %24 = vsyncpa [#allocation18], 0  ;;  %s2166_s21 = smov 0   ;;  %s2168_s22 = smov 0  }
   0xc   :  { %s2170_s23 = smov 0   ;;  %s2172_s24 = smov 0  }
   0xd   :  { %s2174_s25 = smov 0   ;;  %s2176_s26 = smov 0  }
   0xe   :  { %s2178_s27 = smov 0  }
   0xf LB: > { %2741 = sst [smem:[#allocation30_spill]] %s2094_s23  ;;  %s2202_s28 = sadd.s32 4294967295, %s2110_s27   ;;  %s2110_s27 = sphi %s2178_s27, %s2789_s27   ;;  %s2106_s26 = sphi %s2176_s26, %s2784_s26   ;;  %s2102_s25 = sphi %s2174_s25, %s2788_s25   ;;  %s2098_s24 = sphi %s2172_s24, %s2787_s24   ;;  %s2094_s23 = sphi %s2170_s23, %s2782_s23   ;;  %s2090_s22 = sphi %s2168_s22, %s2786_s22   ;;  %s2086_s21 = sphi %s2166_s21, %s2785_s21  }
  0x10   : > { %2742 = sst [smem:[#allocation31_spill]] %s2106_s26  ;;  %s2725_s29 = sadd.s32 4294967294, %s2110_s27  }
  0x11   : > { %s37_s30 = sadd.s32 1, %s2106_s26  ;;  %p44_p0 = scmp.ne.s32.totalorder %s2106_s26, %s2102_s25 }
  0x12   : > { %p2727_p1 = scmp.eq.s32.totalorder %s2110_s27, 0  ;;  %p50_p2 = scmp.ne.s32.totalorder %s2102_s25, %s2098_s24 }
  0x13   : > { %p2729_p3 = scmp.eq.s32.totalorder %s2202_s28, 0  ;;  %p2728_p4 = scmp.eq.s32.totalorder %s2202_s28, 3 }
  0x14   : > { %p2215_p5 = por %p2727_p1, %p44_p0  ;;  %p2221_p6 = scmp.eq.s32.totalorder %s2725_s29, 3 }
  0x15   : > { %p2227_p7 = por %p2729_p3, %p50_p2  ;;  %p2233_p8 = por %p2728_p4, %p44_p0 }
  0x16   : > { %p2239_p9 = por %p2221_p6, %p50_p2  ;;  %p2726_p10 = scmp.lt.s32.totalorder %s2110_s27, 4 }
  0x17   : > { %s2745_s9 = scalar_select %p2227_p7, 1, 0 }
  0x18   : > { %s2746_s10 = scalar_select %p2233_p8, 1, 0 }
  0x19   : > { %s2747_s11 = scalar_select %p2239_p9, 1, 0 }
  0x1a   : > { %s198_s12 = sand.u32 1, %s2106_s26   ;;  %s1488_s14 = sshll.u32 %s2110_s27, 10 }
  0x1b   : > { %s1432_s13 = sshll.u32 %s198_s12, 5  ;;  %s2748_s0 = sld [smem:[#allocation34_spill]] }
  0x1c   : > { %s202_s18 = scalar_lea.vmem [#allocation8], %s1432_s13  ;;  %p2257_p11 = pnand %p2726_p10, %p2215_p5 }
  0x1d   : > { %s210_s19 = sshll.u32 %s202_s18, 4  ;;  %s2261_s29 = scalar_lea.sflag [#allocation9], %s198_s12  ;;  %s2251_s19 = int_to_ptr.vmem [resolvable:$true] %s210_s19 }
  0x1e   : > { %p1841_p13 = pneg %p2257_p11 }
  0x21   : > { %s2249_s17 = scalar_lea.hbm %s2748_s0, %s1488_s14  ;;  %s1844_s7 = scalar_lea.hbm %s2748_s0, 4096 }
  0x22   : > { %s1839_s14 = scalar_lea.hbm %s2249_s17, 512  ;;  %p1845_p5 = scmp.lt.u32.totalorder %s2249_s17, %s2748_s0 }
  0x23   : > { %p1840_p12 = scmp.ne.s32.totalorder %s2249_s17, %s1839_s14  ;;  %p1846_p10 = scmp.lt.u32.totalorder %s1844_s7, %s1839_s14 }
  0x24   : > { %p1848_p4 = scmp.lt.u32.totalorder %s1839_s14, %s2249_s17 }
  0x25   : > { %p1842_p0 = pnand %p1841_p13, %p1840_p12  ;;  %p1847_p1 = por %p1846_p10, %p1845_p5 }
  0x27   : > { %p1843_p2 = pneg %p1842_p0  ;;  %p1849_p3 = por %p1848_p4, %p1847_p1 }
  0x29   : > { %p1850_p9 = pnand %p1849_p3, %p1843_p2 }
  0x2b   : > { %1853 = shalt.err (!%p1850_p9)
}
  0x2c   : > { %s1854_s12 = scalar_lea.vmem %s2251_s19, 512  ;;  %s2112_s13 = smov [#allocation8]  }
  0x2d   : > { %p1855_p12 = scmp.ne.s32.totalorder %s2251_s19, %s1854_s12  ;;  %s1859_s15 = sshll.u32 %s2112_s13, 4  ;;  %s1860_s15 = int_to_ptr.vmem [resolvable:$false] %s1859_s15 }
  0x2e   : > { %s1861_s16 = scalar_lea.vmem %s1860_s15, 1024  ;;  %p1862_p7 = scmp.lt.s32.totalorder %s2251_s19, %s1860_s15 }
  0x2f   : > { %p1857_p0 = pnand %p1855_p12, %p1841_p13  ;;  %p1863_p10 = scmp.lt.s32.totalorder %s1861_s16, %s1854_s12 }
  0x31   : > { %p1858_p8 = pneg %p1857_p0  ;;  %p1864_p5 = por %p1863_p10, %p1862_p7 }
  0x33   : > { %p1865_p1 = pnand %p1864_p5, %p1858_p8 }
  0x35   : > { %1868 = shalt.err (!%p1865_p1)
}
  0x36   : > { %s2732_s14 = smov 256   ;;  %s2733_s7 = smov 128  }
  0x37   : > { %s2734_s18 = smov 8   ;;  %p1439_p3 = scmp.ge.s32.totalorder %s2110_s27, 1 }
  0x38   : > { %1687 = dma.hbm_to_vmem [thread:$0]  (!%p2257_p11), %s2249_s17, 512, %s2251_s19, %s2261_s29, %s2732_s14, %s2733_s7, %s2734_s18  }
  0x39   : > { %p242_p4 = scmp.lt.s32.totalorder %s2110_s27, 5  ;;  %s2299_s13 = sadd.s32 1, %s2110_s27  }
  0x3a   : > { %s34_s20 = ssub.s32 %s2110_s27, %s2299_s13  ;;  %s60_s15 = ssub.s32 3, %s2110_s27 }
  0x3b   : > { %p2294_p7 = pnand %p1439_p3, %p242_p4  ;;  %p35_p8 = scmp.eq.s32.totalorder %s34_s20, 0 }
  0x3c   : > { %s61_s16 = ssub.s32 3, %s2299_s13  ;;  %s65_s17 = sadd.s32 1, %s2094_s23 }
  0x3d   : > { %s62_s29 = ssub.s32 %s60_s15, %s61_s16  ;;  %p72_p11 = scmp.ne.s32.totalorder %s2094_s23, %s2090_s22 }
  0x3e   : > { %s2309_s19 = scalar_select %p35_p8, %s2106_s26, %s37_s30  }
  0x3f   : > { %p63_p9 = scmp.eq.s32.totalorder %s62_s29, 0  ;;  %p78_p13 = scmp.ne.s32.totalorder %s2090_s22, %s2086_s21 }
  0x40   : > { %2751 = sst [smem:[#allocation32_spill]] %s2309_s19  ;;  %s220_s14 = sand.u32 1, %s2094_s23  }
  0x41   : > { %s2317_s7 = scalar_select %p63_p9, %s2094_s23, %s65_s17  }
  0x42   : > { %p2753_p2 = scmp.eq.s32.totalorder %s2202_s28, 0  ;;  %p2755_p0 = scmp.eq.s32.totalorder %s2202_s28, 3 }
  0x43   : > { %2752 = sst [smem:[#allocation33_spill]] %s2317_s7  ;;  %p2333_p5 = por %p2221_p6, %p78_p13 }
  0x44   : > { %p2321_p12 = por %p78_p13, %p2753_p2  ;;  %p2327_p10 = por %p2755_p0, %p72_p11 }
  0x45   : > { %s2757_s30 = scalar_select %p2333_p5, 1, 0 }
  0x46   : > { %s2754_s18 = scalar_select %p2321_p12, 1, 0 }
  0x47   : > { %s2756_s20 = scalar_select %p2327_p10, 1, 0 }
  0x48   : > { %p2758_p1 = scmp.eq.s32.totalorder %s2110_s27, 0  ;;  %s1436_s21 = sshll.u32 %s220_s14, 5 }
  0x49   : > { %s1489_s16 = sshll.u32 %s60_s15, 10  ;;  %s2759_s1 = sld [smem:[#allocation35_spill]] }
  0x4a   : > { %p74_p3 = por %p72_p11, %p2758_p1  ;;  %s224_s19 = scalar_lea.vmem [#allocation11], %s1436_s21 }
  0x4b   : > { %s234_s26 = sshll.u32 %s224_s19, 4  ;;  %p2760_p6 = scmp.lt.s32.totalorder %s2110_s27, 4  ;;  %s2344_s26 = int_to_ptr.vmem [resolvable:$true] %s234_s26 }
  0x4c   : > { %s2352_s15 = scalar_lea.sflag [#allocation12], %s220_s14 }
  0x4d   : > { %p2348_p4 = pnand %p2760_p6, %p74_p3 }
  0x4f   : > { %s1339_s0 = scalar_lea.hbm %s2759_s1, %s1489_s16  ;;  %p1871_p9 = pneg %p2348_p4 }
  0x50   : > { %s2342_s7 = scalar_lea.hbm %s1339_s0, 128  ;;  %s1899_s29 = scalar_lea.hbm %s1339_s0, 640 }
  0x51   : > { %p1870_p8 = scmp.ne.s32.totalorder %s2342_s7, %s1899_s29  ;;  %s1874_s16 = scalar_lea.hbm %s2759_s1, 4096 }
  0x52   : > { %p1875_p2 = scmp.lt.u32.totalorder %s2342_s7, %s2759_s1  ;;  %p1876_p0 = scmp.lt.u32.totalorder %s1874_s16, %s1899_s29 }
  0x53   : > { %p1872_p11 = pnand %p1871_p9, %p1870_p8  ;;  %p1878_p3 = scmp.lt.u32.totalorder %s1899_s29, %s2342_s7 }
  0x54   : > { %p1877_p1 = por %p1876_p0, %p1875_p2 }
  0x55   : > { %p1873_p13 = pneg %p1872_p11 }
  0x56   : > { %p1879_p6 = por %p1878_p3, %p1877_p1 }
  0x58   : > { %p1880_p5 = pnand %p1879_p6, %p1873_p13 }
  0x5a   : > { %1883 = shalt.err (!%p1880_p5)
}
  0x5b   : > { %s1884_s0 = scalar_lea.vmem %s2344_s26, 512  ;;  %s2116_s14 = smov [#allocation11]  }
  0x5c   : > { %p1885_p8 = scmp.ne.s32.totalorder %s2344_s26, %s1884_s0  ;;  %s1889_s19 = sshll.u32 %s2116_s14, 4  ;;  %s1890_s19 = int_to_ptr.vmem [resolvable:$false] %s1889_s19 }
  0x5d   : > { %s1891_s23 = scalar_lea.vmem %s1890_s19, 1024  ;;  %p1892_p12 = scmp.lt.s32.totalorder %s2344_s26, %s1890_s19 }
  0x5e   : > { %p1887_p11 = pnand %p1885_p8, %p1871_p9  ;;  %p1893_p2 = scmp.lt.s32.totalorder %s1891_s23, %s1884_s0 }
  0x60   : > { %p1888_p10 = pneg %p1887_p11  ;;  %p1894_p0 = por %p1893_p2, %p1892_p12 }
  0x62   : > { %p1895_p1 = pnand %p1894_p0, %p1888_p10 }
  0x64   : > { %1898 = shalt.err (!%p1895_p1)
}
  0x65   : > { %s2762_s29 = smov 8   ;;  %s2763_s21 = smov 128  }
  0x66   : > { %s2764_s16 = smov 256   ;;  %246 = sbr.rel (%p2294_p7) target bundleno = 3070 (0xbfe), region = 28 }
  0x67   : > { %1690 = dma.hbm_to_vmem [thread:$0]  (!%p2348_p4), %s2342_s7, 512, %s2344_s26, %s2352_s15, %s2764_s16, %s2763_s21, %s2762_s29  }
  0x68   : > { %s2385_s17 = sand.u32 (!%p2294_p7), 1, %s2102_s25   ;;  %p2765_p12 = scmp.ne.s32.totalorder (!%p2294_p7), %s2745_s9, 0 }
  0x69   : > { %s1440_s0 = sshll.u32 (!%p2294_p7), %s2385_s17, 5  ;;  %s249_s14 = scalar_lea.sflag (!%p2294_p7), [#allocation9], %s2385_s17 }
  0x6a   : > { %s2389_s19 = scalar_lea.vmem (!%p2294_p7), [#allocation8], %s1440_s0 }
  0x6d   : > { %2059 = dma.done.wait (%p2765_p12), %s249_s14, 512  }
  0x6e   : > { %2061 = vsyncadd (%p2765_p12), %s249_s14, 4294966784  ;;  %s257_s26 = sand.u32 1, %s2090_s22   ;;  %p2766_p7 = scmp.ne.s32.totalorder %s2754_s18, 0 }
  0x6f   : > { %s1441_s7 = sshll.u32 %s257_s26, 5  ;;  %s258_s12 = scalar_lea.sflag [#allocation12], %s257_s26 }
  0x70   : > { %s2396_s8 = scalar_lea.vmem [#allocation11], %s1441_s7 }
  0x71   : > { %2063 = dma.done.wait (%p2766_p7), %s258_s12, 512  }
  0x72   : > { %2065 = vsyncadd (%p2766_p7), %s258_s12, 4294966784  ;;  %s2402_s15 = scalar_lea.vmem [#allocation13], %s1440_s0  ;;  %s2404_s23 = scalar_lea.vmem [#allocation14], %s1441_s7 }
  0x73   : > { %p1444_p10 = scmp.ne.s32.totalorder %s2202_s28, 0 }
  0x74   : > { %s2117_s9 = smov (!%p1444_p10), [#allocation2]   ;;  %s1900_s14 = scalar_lea.hbm (!%p1444_p10), %s2720_s2, 1024 }
  0x75   : > { %307 = sbr.rel (%p1444_p10) target bundleno = 138 (0x8a), region = 40  ;;  %s315_s29 = sshll.u32 (!%p1444_p10), %s2117_s9, 4  ;;  %s316_s29 = int_to_ptr.vmem [resolvable:$true] %s315_s29 }
  0x76   : > { %p1901_p5 = scmp.ne.s32.totalorder (!%p1444_p10), %s2720_s2, %s1900_s14  ;;  %p1904_p4 = scmp.lt.u32.totalorder (!%p1444_p10), %s1900_s14, %s2720_s2 }
  0x78   : > { %p1906_p9 = pnand (!%p1444_p10), %p1904_p4, %p1901_p5 }
  0x7c   : > { %1909 = shalt.err (!%p1906_p9)  }
  0x7d   : > { %s1910_s0 = scalar_lea.vmem %s316_s29, 1024  ;;  %p1915_p3 = scmp.lt.s32.totalorder %s316_s29, %s316_s29 }
  0x7e   : > { %p1911_p13 = scmp.ne.s32.totalorder %s316_s29, %s1910_s0  ;;  %p1916_p6 = scmp.lt.s32.totalorder %s1910_s0, %s1910_s0 }
  0x80   : > { %p1917_p8 = por %p1916_p6, %p1915_p3 }
  0x82   : > { %p1918_p11 = pnand %p1917_p8, %p1911_p13 }
  0x84   : > { %1921 = shalt.err (!%p1918_p11)  }
  0x85   : > { %318 = dma.hbm_to_vmem [thread:$0]  %s2720_s2, 1024, %s316_s29, [#allocation3] }
  0x86   : > { %2066 = dma.done.wait [#allocation3], 1024 }
  0x87   : > { %2067 = vsyncadd [#allocation3], 4294966272  ;;  %vm323_vm0 = vcmask 261120   ;;  %v2118_v0 = vmov 0.0  }
  0x88   : > { %324 = vst.msk [vmem:[#allocation4] sm:$0xff] %vm323_vm0, %v2118_v0  ;;  %325 = vst.msk [vmem:[#allocation5] sm:$0xff] %vm323_vm0, %v2118_v0 }
  0x89   : > { %326 = vst.msk [vmem:[#allocation6] sm:$0xff] %vm323_vm0, %v2118_v0  ;;  %327 = vst.msk [vmem:[#allocation7] sm:$0xff] %vm323_vm0, %v2118_v0 }
  0x8a PF: > { %v328_v1 = vld [vmem:[#allocation2] sm:$0xff]  ;;  %v329_v2 = vld [vmem:[#allocation2 + $0x8] sm:$0xff]  ;;  %v2119_v4 = vmov 0.0|0.0   ;;  %v330_v7 = vld [vmem:[#allocation2 + $0x10] sm:$0xff]  ;;  %vm2120_vm1 = vmmov 0   ;;  %v2121_v10 = vmov 0.0  }
  0x8b   : > { %v333_v3 = vld [vmem:[#allocation2 + $0x20] sm:$0xff]  ;;  %1620 = vmatprep.subr.bf16.mxu0 %v2119_v4  ;;  %v2420_v5 = vpack.c.bf16 %v329_v2, %v328_v1  ;;  %1626 = vmatprep.subr.bf16.mxu1 %v2119_v4  ;;  %v334_v6 = vld [vmem:[#allocation2 + $0x28] sm:$0xff]  ;;  %v331_v8 = vld [vmem:[#allocation2 + $0x18] sm:$0xff]  ;;  %s2122_s1 = smov 32   ;;  %vm342_vm2 = vcmask 261120   ;;  %s2123_s29 = smov 64  }
  0x8c   : > { %v2423_v9 = vpack.c.bf16 %v334_v6, %v333_v3  ;;  %1540 = vmatprep.mubr.msk.f32.mxu0 %vm2120_vm1, %v2121_v10  ;;  %v335_v11 = vld [vmem:[#allocation2 + $0x30] sm:$0xff]  ;;  %v336_v12 = vld [vmem:[#allocation2 + $0x38] sm:$0xff]  ;;  %1551 = vmatprep.mubr.msk.f32.mxu1 %vm2120_vm1, %v2121_v10  ;;  %v2430_v13 = vpack.c.bf16 %v331_v8, %v330_v7  ;;  %v341_v19 = vld [vmem:[%s2389_s19] sm:$0xff]  ;;  %p1473_p2 = scmp.ne.s32.totalorder %s2202_s28, 3 }
  0x8d   : > { %1622 = vmatpush3.bf16.msra.mxu0 %v2420_v5  ;;  %v2434_v15 = vpack.c.bf16 %v336_v12, %v335_v11  ;;  %v1447_v20 = vld [vmem:[%s2396_s8 + $0x18] sm:$0xff]  ;;  %v1451_v57 = vld [vmem:[%s2389_s19 + $0x8] sm:$0xff]  ;;  %v1455_v61 = vld [vmem:[%s2396_s8 + $0x10] sm:$0xff] }
  0x8e   : > { %1623 = vmatprep.subr.bf16.mxu0 %v2119_v4  ;;  %1628 = vmatpush3.bf16.msra.mxu1 %v2423_v9 }
  0x8f   : > { %v338_v14 = vld [vmem:[#allocation5] sm:$0xff]  ;;  %1629 = vmatprep.subr.bf16.mxu1 %v2119_v4  ;;  %v337_v17 = vld [vmem:[#allocation4] sm:$0xff] }
  0x90   : > { %425 = vrot.lane.b32.xlu1 %v338_v14, %s2122_s1  ;;  %v340_v16 = vld [vmem:[#allocation7] sm:$0xff]  ;;  %v339_v18 = vld [vmem:[#allocation6] sm:$0xff] }
  0x91   : > { %1625 = vmatpush3.bf16.msra.mxu0 %v2430_v13 }
  0x92   : > { %1631 = vmatpush3.bf16.msra.mxu1 %v2434_v15  ;;  %1632 = vmatprep.subr.bf16.mxu0 %v2119_v4 }
  0x93   : > { %1638 = vmatprep.subr.bf16.mxu1 %v2119_v4 }
  0x94   : > { %534 = vrot.lane.b32.xlu1 %v340_v16, %s2122_s1  ;;  %1541 = vmatmul.mubr.msk.f32.vlgmr.msra.gmra.mrb[0].mxu0 %vm342_vm2, %v337_v17 }
  0x95   : > { %1552 = vmatmul.mubr.msk.f32.vlgmr.msra.gmra.mrb[0].mxu1 %vm342_vm2, %v339_v18  ;;  %1634 = vmatpush3.bf16.msra.mxu0 %v2420_v5 }
  0x96   : > { %1635 = vmatprep.subr.bf16.mxu0 %v2119_v4  ;;  %1640 = vmatpush3.bf16.msra.mxu1 %v2423_v9 }
  0x97   : > { %1562 = vmatprep.mubr.msk.f32.mxu0 %vm2120_vm1, %v2121_v10  ;;  %1641 = vmatprep.subr.bf16.mxu1 %v2119_v4 }
  0x98   : > { %1573 = vmatprep.mubr.msk.f32.mxu1 %vm2120_vm1, %v2121_v10 }
  0x99   : > { %1637 = vmatpush3.bf16.msra.mxu0 %v2430_v13 }
  0x9a   : > { %1643 = vmatpush3.bf16.msra.mxu1 %v2434_v15  ;;  %1644 = vmatprep.subr.bf16.mxu0 %v2119_v4 }
  0x9b   : > { %1650 = vmatprep.subr.bf16.mxu1 %v2119_v4 }
 0x102   : > { %v426_v41 = vpop.permute.xlu1 %425 }
 0x106   : > { %v535_v43 = vpop.permute.xlu1 %534 }
 0x167   : > { %v412_v21 = vpop.f32.mrb[0].mxu0 }
 0x168   : > { %v416_v22 = vadd.f32 %v412_v21, %v341_v19  ;;  %v1542_v23 = vpop.f32.mrb[1].mxu0  ;;  %v521_v24 = vpop.f32.mrb[0].mxu1 }
 0x169   : > { %v525_v25 = vadd.f32 %v1447_v20, %v521_v24  ;;  %v1553_v26 = vpop.f32.mrb[1].mxu1 }
 0x16a   : > { %1775 = vtanh.f32 %v416_v22  ;;  %v1446_v29 = vmul.f32 -1.442695, %v416_v22 }
 0x16b   : > { %1777 = vtanh.f32 %v525_v25  ;;  %v1449_v30 = vmul.f32 -1.442695, %v525_v25 }
 0x16c   : > { %1779 = vpow2.f32 %v1446_v29 }
 0x16d   : > { %1781 = vpow2.f32 %v1449_v30 }
 0x174   : > { %v1776_v27 = vpop.eup %1775 }
 0x175   : > { %430 = vrot.lane.b32.xlu0 %v1776_v27, %s2123_s29  ;;  %v1778_v28 = vpop.eup %1777 }
 0x176   : > { %v1780_v31 = vpop.eup %1779 }
 0x177   : > { %v420_v32 = vadd.f32 1.0, %v1780_v31  ;;  %v1782_v33 = vpop.eup %1781 }
 0x178   : > { %v529_v34 = vadd.f32 1.0, %v1782_v33 }
 0x179   : > { %539 = vrot.lane.b32.xlu0 %v1778_v28, %s2123_s29  ;;  %1783 = vrcp.f32 %v420_v32 }
 0x17a   : > { %1785 = vrcp.f32 %v529_v34 }
 0x183   : > { %v1784_v35 = vpop.eup %1783 }
 0x184   : > { %v1786_v38 = vpop.eup %1785  ;;  %v428_v42 = vmul.f32 %v1784_v35, %v426_v41 }
 0x185   : > { %v537_v46 = vmul.f32 %v1786_v38, %v535_v43 }
 0x1e7   : > { %v431_v36 = vpop.permute.xlu0 %430 }
 0x1e8   : > { %v433_v37 = vmul.f32 %v1784_v35, %v431_v36 }
 0x1ea   : > { %435 = vrot.lane.b32.xlu0 %v433_v37, %s2122_s1 }
 0x1eb   : > { %v540_v39 = vpop.permute.xlu0 %539 }
 0x1ec   : > { %v542_v40 = vmul.f32 %v1786_v38, %v540_v39 }
 0x1ee   : > { %544 = vrot.lane.b32.xlu1 %v542_v40, %s2122_s1 }
 0x25c   : > { %v436_v44 = vpop.permute.xlu0 %435 }
 0x25d   : > { %v2463_v45 = vadd.f32 %v436_v44, %v428_v42 }
 0x25f   : > { %1787 = vtanh.f32 %v2463_v45 }
 0x260   : > { %v545_v47 = vpop.permute.xlu1 %544 }
 0x261   : > { %v2466_v48 = vadd.f32 %v545_v47, %v537_v46 }
 0x263   : > { %1789 = vtanh.f32 %v2466_v48 }
 0x269   : > { %v1788_v49 = vpop.eup %1787 }
 0x26a   : > { %441 = vrot.lane.b32.xlu0 %v1788_v49, %s2123_s29 }
 0x26d   : > { %v1790_v50 = vpop.eup %1789 }
 0x26e   : > { %550 = vrot.lane.b32.xlu1 %v1790_v50, %s2123_s29 }
 0x2dc   : > { %v442_v51 = vpop.permute.xlu0 %441 }
 0x2dd   : > { %v444_v52 = vmul.f32 %v1784_v35, %v442_v51 }
 0x2df   : > { %446 = vrot.lane.b32.xlu0 %v444_v52, %s2122_s1 }
 0x2e0   : > { %v551_v53 = vpop.permute.xlu1 %550 }
 0x2e1   : > { %v553_v54 = vmul.f32 %v1786_v38, %v551_v53  ;;  %v1463_v38 = vld [vmem:[%s2396_s8 + $0x8] sm:$0xff] }
 0x2e3   : > { %555 = vrot.lane.b32.xlu1 %v553_v54, %s2122_s1 }
 0x351   : > { %v447_v55 = vpop.permute.xlu0 %446 }
 0x352   : > { %449 = vst.msk [vmem:[%s2402_s15] sm:$0xff] %vm342_vm2, %v447_v55  ;;  %1563 = vmatmul.mubr.msk.f32.vlgmr.msra.gmra.mrb[2].mxu0 %vm342_vm2, %v447_v55 }
 0x353   : > { %1646 = vmatpush3.bf16.msra.mxu0 %v2420_v5  ;;  %1584 = vmatprep.mubr.msk.f32.mxu0 %vm2120_vm1, %v2121_v10 }
 0x354   : > { %1647 = vmatprep.subr.bf16.mxu0 %v2119_v4 }
 0x355   : > { %v556_v56 = vpop.permute.xlu1 %555 }
 0x356   : > { %1450 = vst.msk [vmem:[%s2404_s23 + $0x18] sm:$0xff] %vm342_vm2, %v556_v56  ;;  %1574 = vmatmul.mubr.msk.f32.vlgmr.msra.gmra.mrb[2].mxu1 %vm342_vm2, %v556_v56 }
 0x357   : > { %1649 = vmatpush3.bf16.msra.mxu0 %v2430_v13  ;;  %1652 = vmatpush3.bf16.msra.mxu1 %v2423_v9 }
 0x358   : > { %1653 = vmatprep.subr.bf16.mxu1 %v2119_v4  ;;  %1595 = vmatprep.mubr.msk.f32.mxu1 %vm2120_vm1, %v2121_v10 }
 0x359   : > { %1656 = vmatprep.subr.bf16.mxu0 %v2119_v4 }
 0x35b   : > { %1655 = vmatpush3.bf16.msra.mxu1 %v2434_v15 }
 0x35c   : > { %1662 = vmatprep.subr.bf16.mxu1 %v2119_v4 }
 0x425   : > { %v630_v58 = vpop.f32.mrb[2].mxu0 }
 0x426   : > { %v634_v59 = vadd.f32 %v1451_v57, %v630_v58  ;;  %v1564_v60 = vpop.f32.mrb[3].mxu0 }
 0x428   : > { %1791 = vtanh.f32 %v634_v59  ;;  %v1453_v3 = vmul.f32 -1.442695, %v634_v59 }
 0x429   : > { %v735_v62 = vpop.f32.mrb[2].mxu1 }
 0x42a   : > { %v739_v63 = vadd.f32 %v1455_v61, %v735_v62  ;;  %v1575_v0 = vpop.f32.mrb[3].mxu1 }
 0x42c   : > { %1793 = vtanh.f32 %v739_v63  ;;  %v1457_v6 = vmul.f32 -1.442695, %v739_v63 }
 0x42d   : > { %1795 = vpow2.f32 %v1453_v3 }
 0x42e   : > { %1797 = vpow2.f32 %v1457_v6 }
 0x432   : > { %v1792_v1 = vpop.eup %1791 }
 0x433   : > { %644 = vrot.lane.b32.xlu0 %v1792_v1, %s2123_s29  ;;  %v1467_v1 = vld [vmem:[%s2389_s19 + $0x18] sm:$0xff] }
 0x436   : > { %v1794_v2 = vpop.eup %1793 }
 0x437   : > { %749 = vrot.lane.b32.xlu1 %v1794_v2, %s2123_s29  ;;  %v1796_v7 = vpop.eup %1795 }
 0x438   : > { %v638_v8 = vadd.f32 1.0, %v1796_v7  ;;  %v1798_v11 = vpop.eup %1797  ;;  %v1085_v7 = vld [vmem:[%s2396_s8] sm:$0xff] }
 0x439   : > { %v743_v12 = vadd.f32 1.0, %v1798_v11 }
 0x43a   : > { %1799 = vrcp.f32 %v638_v8 }
 0x43b   : > { %1801 = vrcp.f32 %v743_v12 }
 0x444   : > { %v1800_v14 = vpop.eup %1799 }
 0x445   : > { %v1802_v18 = vpop.eup %1801  ;;  %v642_v21 = vmul.f32 %v1800_v14, %v2463_v45 }
 0x446   : > { %v747_v24 = vmul.f32 %v1802_v18, %v2466_v48 }
 0x4a5   : > { %v645_v16 = vpop.permute.xlu0 %644 }
 0x4a6   : > { %v647_v17 = vmul.f32 %v1800_v14, %v645_v16 }
 0x4a8   : > { %649 = vrot.lane.b32.xlu0 %v647_v17, %s2122_s1 }
 0x4a9   : > { %v750_v19 = vpop.permute.xlu1 %749 }
 0x4aa   : > { %v752_v20 = vmul.f32 %v1802_v18, %v750_v19 }
 0x4ac   : > { %754 = vrot.lane.b32.xlu1 %v752_v20, %s2122_s1 }
 0x51a   : > { %v650_v22 = vpop.permute.xlu0 %649 }
 0x51b   : > { %v652_v23 = vadd.f32 %v650_v22, %v642_v21 }
 0x51d   : > { %1803 = vtanh.f32 %v652_v23 }
 0x51e   : > { %v755_v25 = vpop.permute.xlu1 %754 }
 0x51f   : > { %v757_v26 = vadd.f32 %v755_v25, %v747_v24 }
 0x521   : > { %1805 = vtanh.f32 %v757_v26 }
 0x527   : > { %v1804_v27 = vpop.eup %1803 }
 0x528   : > { %655 = vrot.lane.b32.xlu0 %v1804_v27, %s2123_s29 }
 0x52b   : > { %v1806_v28 = vpop.eup %1805 }
 0x52c   : > { %760 = vrot.lane.b32.xlu1 %v1806_v28, %s2123_s29 }
 0x59a   : > { %v656_v29 = vpop.permute.xlu0 %655 }
 0x59b   : > { %v658_v30 = vmul.f32 %v1800_v14, %v656_v29 }
 0x59d   : > { %660 = vrot.lane.b32.xlu0 %v658_v30, %s2122_s1 }
 0x59e   : > { %v761_v31 = vpop.permute.xlu1 %760 }
 0x59f   : > { %v763_v32 = vmul.f32 %v1802_v18, %v761_v31 }
 0x5a1   : > { %765 = vrot.lane.b32.xlu1 %v763_v32, %s2122_s1 }
 0x60f   : > { %v661_v33 = vpop.permute.xlu0 %660 }
 0x610   : > { %1454 = vst.msk [vmem:[%s2402_s15 + $0x8] sm:$0xff] %vm342_vm2, %v661_v33  ;;  %1585 = vmatmul.mubr.msk.f32.vlgmr.msra.gmra.mrb[4].mxu0 %vm342_vm2, %v661_v33 }
 0x611   : > { %1658 = vmatpush3.bf16.msra.mxu0 %v2420_v5  ;;  %1606 = vmatprep.mubr.msk.f32.mxu0 %vm2120_vm1, %v2121_v10  ;;  %v1459_v5 = vld [vmem:[%s2389_s19 + $0x10] sm:$0xff]  ;;  %s2124_s19 = smov 96  }
 0x612   : > { %1659 = vmatprep.subr.bf16.mxu0 %v2119_v4 }
 0x613   : > { %v766_v34 = vpop.permute.xlu1 %765 }
 0x614   : > { %1458 = vst.msk [vmem:[%s2404_s23 + $0x10] sm:$0xff] %vm342_vm2, %v766_v34  ;;  %1596 = vmatmul.mubr.msk.f32.vlgmr.msra.gmra.mrb[4].mxu1 %vm342_vm2, %v766_v34 }
 0x615   : > { %1661 = vmatpush3.bf16.msra.mxu0 %v2430_v13  ;;  %1664 = vmatpush3.bf16.msra.mxu1 %v2423_v9 }
 0x616   : > { %1665 = vmatprep.subr.bf16.mxu1 %v2119_v4  ;;  %1617 = vmatprep.mubr.msk.f32.mxu1 %vm2120_vm1, %v2121_v10 }
 0x619   : > { %1667 = vmatpush3.bf16.msra.mxu1 %v2434_v15 }
 0x6e3   : > { %v840_v35 = vpop.f32.mrb[4].mxu0 }
 0x6e4   : > { %v844_v36 = vadd.f32 %v1459_v5, %v840_v35  ;;  %v1586_v37 = vpop.f32.mrb[5].mxu0 }
 0x6e6   : > { %1807 = vtanh.f32 %v844_v36  ;;  %v1461_v4 = vmul.f32 -1.442695, %v844_v36 }
 0x6e7   : > { %v945_v39 = vpop.f32.mrb[4].mxu1 }
 0x6e8   : > { %v949_v40 = vadd.f32 %v1463_v38, %v945_v39  ;;  %v1597_v41 = vpop.f32.mrb[5].mxu1 }
 0x6ea   : > { %1809 = vtanh.f32 %v949_v40  ;;  %v1465_v10 = vmul.f32 -1.442695, %v949_v40 }
 0x6eb   : > { %1811 = vpow2.f32 %v1461_v4 }
 0x6ec   : > { %1813 = vpow2.f32 %v1465_v10 }
 0x6f0   : > { %v1808_v13 = vpop.eup %1807 }
 0x6f1   : > { %854 = vrot.lane.b32.xlu0 %v1808_v13, %s2123_s29 }
 0x6f4   : > { %v1810_v9 = vpop.eup %1809 }
 0x6f5   : > { %959 = vrot.lane.b32.xlu1 %v1810_v9, %s2123_s29  ;;  %v1812_v15 = vpop.eup %1811 }
 0x6f6   : > { %v848_v42 = vadd.f32 1.0, %v1812_v15  ;;  %v1814_v43 = vpop.eup %1813 }
 0x6f7   : > { %v953_v44 = vadd.f32 1.0, %v1814_v43 }
 0x6f8   : > { %1815 = vrcp.f32 %v848_v42 }
 0x6f9   : > { %1817 = vrcp.f32 %v953_v44 }
 0x702   : > { %v1816_v45 = vpop.eup %1815 }
 0x703   : > { %v1818_v48 = vpop.eup %1817  ;;  %v852_v51 = vmul.f32 %v1816_v45, %v652_v23 }
 0x704   : > { %v957_v54 = vmul.f32 %v1818_v48, %v757_v26 }
 0x763   : > { %v855_v46 = vpop.permute.xlu0 %854 }
 0x764   : > { %v857_v47 = vmul.f32 %v1816_v45, %v855_v46 }
 0x766   : > { %859 = vrot.lane.b32.xlu0 %v857_v47, %s2122_s1 }
 0x767   : > { %v960_v49 = vpop.permute.xlu1 %959 }
 0x768   : > { %v962_v50 = vmul.f32 %v1818_v48, %v960_v49 }
 0x76a   : > { %964 = vrot.lane.b32.xlu1 %v962_v50, %s2122_s1 }
 0x7d8   : > { %v860_v52 = vpop.permute.xlu0 %859 }
 0x7d9   : > { %v862_v53 = vadd.f32 %v860_v52, %v852_v51 }
 0x7db   : > { %1819 = vtanh.f32 %v862_v53 }
 0x7dc   : > { %v965_v55 = vpop.permute.xlu1 %964 }
 0x7dd   : > { %v967_v56 = vadd.f32 %v965_v55, %v957_v54 }
 0x7df   : > { %1821 = vtanh.f32 %v967_v56 }
 0x7e5   : > { %v1820_v57 = vpop.eup %1819 }
 0x7e6   : > { %865 = vrot.lane.b32.xlu0 %v1820_v57, %s2123_s29 }
 0x7e9   : > { %v1822_v58 = vpop.eup %1821 }
 0x7ea   : > { %970 = vrot.lane.b32.xlu1 %v1822_v58, %s2123_s29 }
 0x858   : > { %v866_v59 = vpop.permute.xlu0 %865 }
 0x859   : > { %v868_v60 = vmul.f32 %v1816_v45, %v866_v59 }
 0x85b   : > { %870 = vrot.lane.b32.xlu0 %v868_v60, %s2122_s1 }
 0x85c   : > { %v971_v61 = vpop.permute.xlu1 %970 }
 0x85d   : > { %v973_v62 = vmul.f32 %v1818_v48, %v971_v61 }
 0x85f   : > { %975 = vrot.lane.b32.xlu1 %v973_v62, %s2122_s1 }
 0x8cd   : > { %v871_v63 = vpop.permute.xlu0 %870 }
 0x8ce   : > { %1462 = vst.msk [vmem:[%s2402_s15 + $0x10] sm:$0xff] %vm342_vm2, %v871_v63  ;;  %1607 = vmatmul.mubr.msk.f32.vlgmr.msra.gmra.mrb[6].mxu0 %vm342_vm2, %v871_v63 }
 0x8d1   : > { %v976_v0 = vpop.permute.xlu1 %975 }
 0x8d2   : > { %1466 = vst.msk [vmem:[%s2404_s23 + $0x8] sm:$0xff] %vm342_vm2, %v976_v0  ;;  %1618 = vmatmul.mubr.msk.f32.vlgmr.msra.gmra.mrb[6].mxu1 %vm342_vm2, %v976_v0 }
 0x9a1   : > { %v1050_v2 = vpop.f32.mrb[6].mxu0 }
 0x9a2   : > { %v1054_v3 = vadd.f32 %v1467_v1, %v1050_v2  ;;  %v1608_v6 = vpop.f32.mrb[7].mxu0 }
 0x9a4   : > { %1823 = vtanh.f32 %v1054_v3  ;;  %v1469_v17 = vmul.f32 -1.442695, %v1054_v3 }
 0x9a5   : > { %v1154_v8 = vpop.f32.mrb[6].mxu1 }
 0x9a6   : > { %v1158_v11 = vadd.f32 %v1154_v8, %v1085_v7  ;;  %v1619_v12 = vpop.f32.mrb[7].mxu1 }
 0x9a8   : > { %1825 = vtanh.f32 %v1158_v11  ;;  %v1472_v18 = vmul.f32 -1.442695, %v1158_v11 }
 0x9a9   : > { %1827 = vpow2.f32 %v1469_v17 }
 0x9aa   : > { %1829 = vpow2.f32 %v1472_v18 }
 0x9ae   : > { %v1824_v14 = vpop.eup %1823 }
 0x9af   : > { %1064 = vrot.lane.b32.xlu0 %v1824_v14, %s2123_s29 }
 0x9b2   : > { %v1826_v16 = vpop.eup %1825 }
 0x9b3   : > { %1168 = vrot.lane.b32.xlu1 %v1826_v16, %s2123_s29  ;;  %v1828_v19 = vpop.eup %1827 }
 0x9b4   : > { %v1058_v20 = vadd.f32 1.0, %v1828_v19  ;;  %v1830_v21 = vpop.eup %1829 }
 0x9b5   : > { %v1162_v22 = vadd.f32 1.0, %v1830_v21 }
 0x9b6   : > { %1831 = vrcp.f32 %v1058_v20 }
 0x9b7   : > { %1833 = vrcp.f32 %v1162_v22 }
 0x9c0   : > { %v1832_v23 = vpop.eup %1831 }
 0x9c1   : > { %v1834_v26 = vpop.eup %1833  ;;  %v1062_v29 = vmul.f32 %v1832_v23, %v862_v53 }
 0x9c2   : > { %v1166_v32 = vmul.f32 %v1834_v26, %v967_v56 }
 0xa21   : > { %v1065_v24 = vpop.permute.xlu0 %1064 }
 0xa22   : > { %v1067_v25 = vmul.f32 %v1832_v23, %v1065_v24 }
 0xa24   : > { %1069 = vrot.lane.b32.xlu0 %v1067_v25, %s2122_s1 }
 0xa25   : > { %v1169_v27 = vpop.permute.xlu1 %1168 }
 0xa26   : > { %v1171_v28 = vmul.f32 %v1834_v26, %v1169_v27 }
 0xa28   : > { %1173 = vrot.lane.b32.xlu1 %v1171_v28, %s2122_s1 }
 0xa96   : > { %v1070_v30 = vpop.permute.xlu0 %1069 }
 0xa97   : > { %v1072_v31 = vadd.f32 %v1070_v30, %v1062_v29 }
 0xa99   : > { %1835 = vtanh.f32 %v1072_v31 }
 0xa9a   : > { %v1174_v33 = vpop.permute.xlu1 %1173 }
 0xa9b   : > { %v1176_v34 = vadd.f32 %v1174_v33, %v1166_v32 }
 0xa9d   : > { %1837 = vtanh.f32 %v1176_v34 }
 0xaa3   : > { %v1836_v5 = vpop.eup %1835 }
 0xaa4   : > { %1075 = vrot.lane.b32.xlu0 %v1836_v5, %s2123_s29 }
 0xaa7   : > { %v1838_v35 = vpop.eup %1837 }
 0xaa8   : > { %1179 = vrot.lane.b32.xlu1 %v1838_v35, %s2123_s29 }
 0xb16   : > { %v1076_v36 = vpop.permute.xlu0 %1075 }
 0xb17   : > { %v1078_v37 = vmul.f32 %v1832_v23, %v1076_v36 }
 0xb19   : > { %1080 = vrot.lane.b32.xlu0 %v1078_v37, %s2122_s1 }
 0xb1a   : > { %v1180_v38 = vpop.permute.xlu1 %1179 }
 0xb1b   : > { %v1182_v39 = vmul.f32 %v1834_v26, %v1180_v38 }
 0xb1d   : > { %1184 = vrot.lane.b32.xlu1 %v1182_v39, %s2122_s1  ;;  %1190 = vrot.lane.b32.xlu0 %v1072_v31, %s2124_s19 }
 0xb21   : > { %1196 = vrot.lane.b32.xlu1 %v1176_v34, %s2124_s19 }
 0xb8b   : > { %v1081_v40 = vpop.permute.xlu0 %1080 }
 0xb8c   : > { %1470 = vst.msk [vmem:[%s2402_s15 + $0x18] sm:$0xff] %vm342_vm2, %v1081_v40  ;;  %1188 = vst.msk [vmem:[#allocation4] sm:$0xff] %vm342_vm2, %v1081_v40 }
 0xb8d   : > { %1204 = vst.msk [vmem:[#allocation16] sm:$0xff] (!%p1473_p2), %vm342_vm2, %v1081_v40 }
 0xb8e   : > { %1203 = sbr.rel (%p1473_p2) target bundleno = 2965 (0xb95), region = 48 }
 0xb8f   : > { %v1185_v41 = vpop.permute.xlu1 %1184  ;;  %v1191_v13 = vpop.permute.xlu0 %1190 }
 0xb90   : > { %1187 = vst.msk [vmem:[%s2404_s23] sm:$0xff] %vm342_vm2, %v1185_v41  ;;  %1194 = vst.msk [vmem:[#allocation6] sm:$0xff] %vm342_vm2, %v1185_v41 }
 0xb91   : > { %1193 = vst.msk [vmem:[#allocation5] sm:$0xff] %vm342_vm2, %v1191_v13  ;;  %1206 = vst.msk [vmem:[#allocation16 + $0x8] sm:$0xff] (!%p1473_p2), %vm342_vm2, %v1185_v41 }
 0xb92   : > { %1207 = vst.msk [vmem:[#allocation17] sm:$0xff] (!%p1473_p2), %vm342_vm2, %v1191_v13 }
 0xb93   : > { %v1197_v9 = vpop.permute.xlu1 %1196 }
 0xb94   : > { %1199 = vst.msk [vmem:[#allocation7] sm:$0xff] %vm342_vm2, %v1197_v9  ;;  %1209 = vst.msk [vmem:[#allocation17 + $0x8] sm:$0xff] (!%p1473_p2), %vm342_vm2, %v1197_v9 }
 0xb95 PF: > { %s1215_s8 = sand.u32 1, %s2202_s28   ;;  %s1239_s21 = ssub.s32 3, %s2202_s28 }
 0xb96   : > { %s1246_s16 = sshll.u32 %s2404_s23, 4  ;;  %s1491_s14 = sshll.u32 %s1239_s21, 9  ;;  %s2561_s16 = int_to_ptr.vmem [resolvable:$true] %s1246_s16 }
 0xb97   : > { %s2566_s12 = scalar_lea.hbm %s2722_s4, %s1491_s14  ;;  %s2568_s0 = scalar_lea.sflag [#allocation15], %s1215_s8 }
 0xb98   : > { %s1922_s7 = scalar_lea.vmem %s2561_s16, 512  ;;  %p2767_p1 = scmp.ne.s32.totalorder %s2756_s20, 0 }
 0xb99   : > { %p1923_p0 = scmp.ne.s32.totalorder %s2561_s16, %s1922_s7  ;;  %s2125_s9 = smov [#allocation14]  }
 0xb9a   : > { %s1926_s23 = sshll.u32 %s2125_s9, 4  ;;  %s1927_s23 = int_to_ptr.vmem [resolvable:$false] %s1926_s23 }
 0xb9b   : > { %p1924_p12 = pnand %p1923_p0, %p2767_p1  ;;  %s1928_s1 = scalar_lea.vmem %s1927_s23, 1024 }
 0xb9c   : > { %p1929_p10 = scmp.lt.s32.totalorder %s2561_s16, %s1927_s23  ;;  %p1930_p5 = scmp.lt.s32.totalorder %s1928_s1, %s1922_s7 }
 0xb9d   : > { %p1925_p7 = pneg %p1924_p12 }
 0xb9e   : > { %p1931_p4 = por %p1930_p5, %p1929_p10 }
 0xba0   : > { %p1932_p9 = pnand %p1931_p4, %p1925_p7 }
 0xba2   : > { %1935 = shalt.err (!%p1932_p9)
}
 0xba3   : > { %s1936_s29 = scalar_lea.hbm %s2566_s12, 512  ;;  %s1940_s21 = scalar_lea.hbm %s2722_s4, 2048 }
 0xba4   : > { %p1937_p13 = scmp.ne.s32.totalorder %s2566_s12, %s1936_s29  ;;  %p1941_p8 = scmp.lt.u32.totalorder %s2566_s12, %s2722_s4 }
 0xba5   : > { %p1942_p11 = scmp.lt.u32.totalorder %s1940_s21, %s1936_s29  ;;  %p1944_p0 = scmp.lt.u32.totalorder %s1936_s29, %s2566_s12 }
 0xba6   : > { %p1938_p3 = pnand %p1937_p13, %p2767_p1 }
 0xba7   : > { %p1943_p2 = por %p1942_p11, %p1941_p8 }
 0xba8   : > { %p1939_p6 = pneg %p1938_p3 }
 0xba9   : > { %p1945_p12 = por %p1944_p0, %p1943_p2 }
 0xbab   : > { %p1946_p7 = pnand %p1945_p12, %p1939_p6 }
 0xbad   : > { %1949 = shalt.err (!%p1946_p7)
}
 0xbae   : > { %s2126_s18 = smov 128   ;;  %s2127_s7 = smov 8  }
 0xbaf   : > { %1673 = dma.vmem_to_hbm [thread:$0]  (%p2767_p1), %s2561_s16, 512, %s2566_s12, %s2568_s0, %s2126_s18, %s2126_s18, %s2127_s7  }
 0xbb0   : > { %s1490_s9 = sshll.u32 %s2202_s28, 9  ;;  %s1229_s23 = sshll.u32 %s2402_s15, 4  ;;  %s2602_s23 = int_to_ptr.vmem [resolvable:$true] %s1229_s23 }
 0xbb1   : > { %s2600_s19 = scalar_lea.hbm %s2721_s3, %s1490_s9  ;;  %s1211_s8 = scalar_lea.sflag [#allocation10], %s2385_s17 }
 0xbb2   : > { %s1950_s21 = scalar_lea.vmem %s2602_s23, 512  ;;  %p2768_p5 = scmp.ne.s32.totalorder %s2746_s10, 0 }
 0xbb3   : > { %p1951_p10 = scmp.ne.s32.totalorder %s2602_s23, %s1950_s21  ;;  %s2128_s20 = smov [#allocation13]  }
 0xbb4   : > { %s1954_s16 = sshll.u32 %s2128_s20, 4  ;;  %s1955_s16 = int_to_ptr.vmem [resolvable:$false] %s1954_s16 }
 0xbb5   : > { %p1952_p4 = pnand %p1951_p10, %p2768_p5  ;;  %s1956_s15 = scalar_lea.vmem %s1955_s16, 1024 }
 0xbb6   : > { %p1957_p1 = scmp.lt.s32.totalorder %s2602_s23, %s1955_s16  ;;  %p1958_p13 = scmp.lt.s32.totalorder %s1956_s15, %s1950_s21 }
 0xbb7   : > { %p1953_p9 = pneg %p1952_p4 }
 0xbb8   : > { %p1959_p3 = por %p1958_p13, %p1957_p1 }
 0xbba   : > { %p1960_p6 = pnand %p1959_p3, %p1953_p9 }
 0xbbc   : > { %1963 = shalt.err (!%p1960_p6)
}
 0xbbd   : > { %s1964_s12 = scalar_lea.hbm %s2600_s19, 512  ;;  %s1968_s26 = scalar_lea.hbm %s2721_s3, 2048 }
 0xbbe   : > { %p1965_p8 = scmp.ne.s32.totalorder %s2600_s19, %s1964_s12  ;;  %p1969_p0 = scmp.lt.u32.totalorder %s2600_s19, %s2721_s3 }
 0xbbf   : > { %p1970_p12 = scmp.lt.u32.totalorder %s1968_s26, %s1964_s12  ;;  %p1972_p10 = scmp.lt.u32.totalorder %s1964_s12, %s2600_s19 }
 0xbc0   : > { %p1966_p11 = pnand %p1965_p8, %p2768_p5 }
 0xbc1   : > { %p1971_p7 = por %p1970_p12, %p1969_p0 }
 0xbc2   : > { %p1967_p2 = pneg %p1966_p11 }
 0xbc3   : > { %p1973_p4 = por %p1972_p10, %p1971_p7 }
 0xbc5   : > { %p1974_p9 = pnand %p1973_p4, %p1967_p2 }
 0xbc7   : > { %1977 = shalt.err (!%p1974_p9)
}
 0xbc8   : > { %1672 = dma.vmem_to_hbm [thread:$0]  (%p2768_p5), %s2602_s23, 512, %s2600_s19, %s1211_s8, %s2126_s18, %s2126_s18, %s2127_s7  }
 0xbc9   : > { %s2129_s29 = smov [#allocation16]   ;;  %s2130_s20 = smov [#allocation17]  }
 0xbca   : > { %s1259_s21 = sshll.u32 %s2129_s29, 4  ;;  %s1272_s16 = sshll.u32 %s2130_s20, 4  ;;  %s1260_s21 = int_to_ptr.vmem [resolvable:$true] %s1259_s21  ;;  %s2631_s16 = int_to_ptr.vmem [resolvable:$true] %s1272_s16 }
 0xbcb   : > { %s1978_s15 = scalar_lea.vmem %s1260_s21, 256  ;;  %p2769_p13 = scmp.eq.s32.totalorder %s2202_s28, 3 }
 0xbcc   : > { %p1979_p1 = scmp.ne.s32.totalorder %s1260_s21, %s1978_s15  ;;  %p1985_p8 = scmp.lt.s32.totalorder %s1260_s21, %s1260_s21 }
 0xbcd   : > { %p1986_p11 = scmp.lt.s32.totalorder %s1978_s15, %s1978_s15 }
 0xbce   : > { %p1980_p3 = pnand %p1979_p1, %p2769_p13 }
 0xbcf   : > { %p1987_p2 = por %p1986_p11, %p1985_p8 }
 0xbd0   : > { %p1981_p6 = pneg %p1980_p3 }
 0xbd2   : > { %p1988_p0 = pnand %p1987_p2, %p1981_p6 }
 0xbd4   : > { %1991 = shalt.err (!%p1988_p0)
}
 0xbd5   : > { %s1992_s23 = scalar_lea.hbm %s2723_s5, 256  ;;  %p2770_p12 = pmov %p2769_p13 }
 0xbd6   : > { %p1993_p5 = scmp.ne.s32.totalorder %s2723_s5, %s1992_s23  ;;  %p1998_p4 = scmp.lt.u32.totalorder %s1992_s23, %s2723_s5 }
 0xbd8   : > { %p1994_p7 = pnand %p1993_p5, %p2770_p12 }
 0xbda   : > { %p1995_p10 = pneg %p1994_p7 }
 0xbdc   : > { %p2000_p9 = pnand %p1998_p4, %p1995_p10 }
 0xbde   : > { %2003 = shalt.err (!%p2000_p9)
}
 0xbdf   : > { %p2771_p1 = pmov %p2770_p12  ;;  %s2004_s9 = scalar_lea.vmem %s2631_s16, 256 }
 0xbe0   : > { %p2005_p13 = scmp.ne.s32.totalorder %s2631_s16, %s2004_s9  ;;  %p2011_p11 = scmp.lt.s32.totalorder %s2631_s16, %s2631_s16 }
 0xbe1   : > { %1675 = dma.vmem_to_hbm [thread:$0]  (%p2771_p1), %s1260_s21, 256, %s2723_s5, [#allocation15], %s2126_s18, %s2126_s18, %s2127_s7  }
 0xbe2   : > { %p2772_p3 = pmov %p2771_p1  ;;  %p2012_p2 = scmp.lt.s32.totalorder %s2004_s9, %s2004_s9 }
 0xbe4   : > { %p2006_p6 = pnand %p2005_p13, %p2772_p3  ;;  %p2013_p0 = por %p2012_p2, %p2011_p11 }
 0xbe6   : > { %p2007_p8 = pneg %p2006_p6 }
 0xbe8   : > { %p2014_p5 = pnand %p2013_p0, %p2007_p8 }
 0xbea   : > { %2017 = shalt.err (!%p2014_p5)
}
 0xbeb   : > { %s2018_s20 = scalar_lea.hbm %s2724_s6, 256  ;;  %p2773_p7 = pmov %p2771_p1 }
 0xbec   : > { %p2019_p12 = scmp.ne.s32.totalorder %s2724_s6, %s2018_s20  ;;  %p2024_p9 = scmp.lt.u32.totalorder %s2018_s20, %s2724_s6 }
 0xbee   : > { %p2020_p10 = pnand %p2019_p12, %p2773_p7 }
 0xbf0   : > { %p2021_p4 = pneg %p2020_p10 }
 0xbf2   : > { %p2026_p1 = pnand %p2024_p9, %p2021_p4 }
 0xbf4   : > { %2029 = shalt.err (!%p2026_p1)
}
 0xbf5   : > { %p2774_p13 = pmov %p2772_p3 }
 0xbf7   : > { %1677 = dma.vmem_to_hbm [thread:$0]  (%p2774_p13), %s2631_s16, 256, %s2724_s6, [#allocation18], %s2126_s18, %s2126_s18, %s2127_s7  }
 0xbf8   : > { %2069 = dma.done.wait (%p2772_p3), [#allocation15], 256   ;;  %p2775_p6 = pmov %p2772_p3 }
 0xbf9   : > { %p2776_p8 = pmov %p2772_p3 }
 0xbfa   : > { %2071 = vsyncadd (%p2775_p6), [#allocation15], 4294967040 }
 0xbfb   : > { %2073 = dma.done.wait (%p2776_p8), [#allocation18], 256   ;;  %p2777_p11 = pmov %p2772_p3 }
 0xbfd   : > { %2075 = vsyncadd (%p2777_p11), [#allocation18], 4294967040 }
 0xbfe PF: > { %p1703_p2 = scmp.ge.s32.totalorder %s2110_s27, 2  ;;  %s1295_s8 = sand.u32 1, %s2098_s24  }
 0xbff   : > { %p2778_p0 = scmp.ne.s32.totalorder %s2747_s11, 0  ;;  %s1296_s18 = scalar_lea.sflag [#allocation10], %s1295_s8 }
 0xc01   : > { %p1692_p5 = pnand %p1703_p2, %p2778_p0 }
 0xc03   : > { %2077 = dma.done.wait (!%p1692_p5), %s1296_s18, 512  }
 0xc04   : > { %2079 = vsyncadd (!%p1692_p5), %s1296_s18, 4294966784  ;;  %s2779_s7 = sadd.s32 4294967294, %s2110_s27   ;;  %p2780_p12 = scmp.ne.s32.totalorder %s2757_s30, 0 }
 0xc05   : > { %s1304_s16 = sand.u32 1, %s2779_s7  }
 0xc06   : > { %p1695_p7 = pnand %p1703_p2, %p2780_p12  ;;  %s1305_s12 = scalar_lea.sflag [#allocation15], %s1304_s16 }
 0xc08   : > { %2081 = dma.done.wait (!%p1695_p7), %s1305_s12, 512  }
 0xc09   : > { %2083 = vsyncadd (!%p1695_p7), %s1305_s12, 4294966784  ;;  %s2781_s28 = sld [smem:[#allocation30_spill]]  ;;  %s2782_s23 = sld [smem:[#allocation33_spill]] }
 0xc0a   : > { %s2783_s0 = sld [smem:[#allocation31_spill]]  ;;  %s2784_s26 = sld [smem:[#allocation32_spill]] }
 0xc0b   : > { %p27_p10 = scmp.ge.s32.totalorder %s2299_s13, 6   ;;  %s2785_s21 = smov %s2090_s22 }
 0xc0c   : > { %s2787_s24 = smov %s2102_s25  ;;  %s2789_s27 = smov %s2299_s13 }
 0xc0d   :  { %29 = sbr.rel (!%p27_p10) target bundleno = 15 (0xf), region = 146 }
 0xc0f   : > { %s2786_s22 = smov %s2781_s28 }
 0xc10   : > { %s2788_s25 = smov %s2783_s0 }
 0xc14   :  { %1310 = vsyncpa [#allocation9], 1 }
 0xc15   :  { %1312 = vsyncpa [#allocation9 + $0x1], 1 }
 0xc16   :  { %1313 = vsyncpa [#allocation12], 1 }
 0xc17   :  { %1315 = vsyncpa [#allocation12 + $0x1], 1 }
 0xc18   :  { %1316 = vsyncpa [#allocation10], 1 }
 0xc19   :  { %1318 = vsyncpa [#allocation10 + $0x1], 1 }
 0xc1a   :  { %1319 = vsyncpa [#allocation15], 1 }
 0xc1b   :  { %1321 = vsyncpa [#allocation15 + $0x1], 1 }
 0xc1c   :  { %1322 = vsyncpa [#allocation18], 1 }
 0xc1d   :  { %1323 = vsyncmov [#allocation3] }
 0xc20   :  { %s1324_s27 = vpop.sfrf %1323 }
 0xc21   :  { %p1486_p4 = scmp.ne.s32.totalorder %s1324_s27, 0 }
 0xc23   :  { %1328 = shalt.err (%p1486_p4)  }

</bundles_post_ra>
